<compile_context>
chip_gen: v5e
topology: v5e:2x2
jax: 0.10.0
libtpu: 0.0.40
codegen_flags: <defaults>
</compile_context>

<pallas_src>
import functools

import jax
import jax.numpy as jnp
import numpy as np
from jax.experimental import pallas as pl
from jax.experimental.pallas import tpu as pltpu


# --------------------------------------------------------------------------
# Pallas kernel: full XceptionBlock forward for one (C, Bt*L) batch slab.
# --------------------------------------------------------------------------
def xception_block_kernel(
    x_ref,        # (C_in, N)       f32   N = Bt*L  (Bt samples fused on lanes)
    masks_ref,    # (K, N)          f32   per-tap 0/1 validity masks (precomputed)
    dw1_w_ref,    # (C_in, K)       f32
    dw2_w_ref,    # (C_out, K)      f32
    pw1_w_ref,    # (C_out, C_in)   bf16  (BN1 folded in)
    pw2_w_ref,    # (C_out, C_out)  bf16  (BN2 folded in)
    res_w_ref,    # (C_out, C_in)   bf16  (BNres folded in)
    se_w1_ref,    # (C_hid, C_out)  f32
    se_w2_ref,    # (C_out, C_hid)  f32
    bias_ref,     # (C_out, 3)      f32   columns: [pw1_b | pw2_b | res_b] (folded)
    seg_avg_ref,  # (N, Bt)         f32   block-diagonal 1/L (per-sample mean)
    seg_ones_ref, # (Bt, N)         f32   block-diagonal 1s  (per-sample expand)
    out_ref,      # (C_out, N)
    *, K, pad, dilation, N,
):
    x = x_ref[...]                         # (C_in, N) f32
    dw1_w = dw1_w_ref[...]
    dw2_w = dw2_w_ref[...]
    pw1_b = bias_ref[:, 0:1]
    pw2_b = bias_ref[:, 1:2]
    res_b = bias_ref[:, 2:3]

    def depthwise(h, w):
        # "same" depthwise conv over the fused (C, Bt*L) slab: XLU lane roll +
        # precomputed per-tap masks that zero everything pulled in from outside
        # the current length-L segment (i.e. zero padding AND sample isolation).
        acc = None
        for t in range(K):                  # static unroll over taps
            s = t * dilation - pad          # source offset within a segment
            if s == 0:
                term = h
            else:
                rolled = pltpu.roll(h, shift=(-s) % N, axis=1)  # rolled[j] = h[(j+s)%N]
                term = rolled * masks_ref[t:t + 1, :]
            contrib = w[:, t:t + 1] * term
            acc = contrib if acc is None else acc + contrib
        return acc

    # ---- sepconv1: depthwise (VPU f32) -> pointwise (MXU bf16); BN1 folded; ReLU
    h = depthwise(x, dw1_w)
    h = jnp.dot(pw1_w_ref[...], h.astype(jnp.bfloat16),
                preferred_element_type=jnp.float32) + pw1_b
    h = jnp.maximum(h, 0.0)
    # TODO(synk): train-mode dropout mask (p=0.2) intentionally omitted (eval mode).

    # ---- sepconv2; BN2 folded
    h2 = depthwise(h, dw2_w)
    h2 = jnp.dot(pw2_w_ref[...], h2.astype(jnp.bfloat16),
                 preferred_element_type=jnp.float32) + pw2_b

    # ---- Squeeze-and-Excitation, batched over the Bt fused samples:
    # per-sample means via one matmul against the block-diagonal averaging
    # matrix, two small (., Bt) matmuls, expand back with the ones matrix.
    y = jnp.dot(h2, seg_avg_ref[...], preferred_element_type=jnp.float32)       # (C_out, Bt)
    y = jnp.maximum(jnp.dot(se_w1_ref[...], y,
                            preferred_element_type=jnp.float32), 0.0)           # (C_hid, Bt)
    y = jax.nn.sigmoid(jnp.dot(se_w2_ref[...], y,
                               preferred_element_type=jnp.float32))             # (C_out, Bt)
    scale = jnp.dot(y, seg_ones_ref[...], preferred_element_type=jnp.float32)   # (C_out, N)
    h2 = h2 * scale

    # ---- residual 1x1 conv + BNres (folded) -- computed last (short live range).
    # NOT fused with pw1: the two matmuls have different RHS (h vs. x).
    residual = jnp.dot(res_w_ref[...], x.astype(jnp.bfloat16),
                       preferred_element_type=jnp.float32) + res_b

    out_ref[...] = jnp.maximum(h2 + residual, 0.0).astype(out_ref.dtype)


# --------------------------------------------------------------------------
# Wrapper: BN/bias folding, batch fusion + tiling, pallas_call plumbing.
# --------------------------------------------------------------------------
def xception_block(x, params, *, kernel_size=15, dilation=1, batch_tile=None):
    B, C_in, L = x.shape
    C_out = params["pw1_w"].shape[0]
    K = kernel_size
    pad = (K - 1) // 2 * dilation
    eps = 1e-5

    # Layout requirements for the roll+mask scheme / lane-dense stores.
    assert L % 128 == 0, "L must be a multiple of 128 (pad in the caller if needed)"
    assert pad < L, "roll-based in-kernel padding requires pad < L"
    # TODO(synk): general (non-multiple-of-128) L would need wrapper-side padding
    # plus extra masking of the padded tail before sepconv2.

    # ---- batch tile: largest divisor of B that keeps >= 2 grid steps (software
    # pipelining; on v7x also lets the 'parallel' batch axis feed both TCs) and
    # fits a conservative VMEM budget (sized for v7x's smaller VMEM).
    if batch_tile is None:
        vmem_budget = 24 << 20
        batch_tile = 1
        for bt in range(1, B + 1):
            if B % bt:
                continue
            if B > 1 and B // bt < 2:
                continue
            # double-buffered in/out tiles + f32 live intermediates (rough)
            tile_bytes = bt * L * 4 * (2 * C_in + 2 * C_out + C_in + 3 * C_out)
            if tile_bytes <= vmem_budget:
                batch_tile = bt
    Bt = batch_tile
    assert B % Bt == 0
    N = Bt * L

    # ---- fold BatchNorm (eval) + conv biases into pointwise/residual weights
    def bn_fold(prefix):
        g = params[prefix + "_gamma"]
        b = params[prefix + "_beta"]
        m = params[prefix + "_mean"]
        v = params[prefix + "_var"]
        s = g * jax.lax.rsqrt(v + eps)
        return s, b - m * s

    s1, o1 = bn_fold("bn1")
    s2, o2 = bn_fold("bn2")
    sr, orr = bn_fold("bnr")

    pw1_w = params["pw1_w"] * s1[:, None]
    pw1_b = s1 * (params["pw1_w"] @ params["dw1_b"] + params["pw1_b"]) + o1
    pw2_w = params["pw2_w"] * s2[:, None]
    pw2_b = s2 * (params["pw2_w"] @ params["dw2_b"] + params["pw2_b"]) + o2
    res_w = params["res_w"] * sr[:, None]
    res_b = sr * params["res_b"] + orr
    biases = jnp.stack([pw1_b, pw2_b, res_b], axis=1).astype(jnp.float32)  # (C_out, 3)

    # ---- precomputed per-tap validity masks (lane-within-segment), shared by
    # both depthwise convs; removes all in-kernel iota/compare/select work.
    lane_in_seg = np.arange(N) % L
    mask_rows = np.ones((K, N), np.float32)
    for t in range(K):
        s = t * dilation - pad
        if s < 0:
            mask_rows[t] = (lane_in_seg >= -s).astype(np.float32)
        elif s > 0:
            mask_rows[t] = (lane_in_seg < L - s).astype(np.float32)
    masks = jnp.asarray(mask_rows)

    # ---- block-diagonal per-sample mean / expand matrices for the SE branch
    seg = np.arange(N) // L
    seg_avg = jnp.asarray(
        (seg[:, None] == np.arange(Bt)[None, :]).astype(np.float32) / float(L))  # (N, Bt)
    seg_ones = jnp.asarray(
        (np.arange(Bt)[:, None] == seg[None, :]).astype(np.float32))             # (Bt, N)

    consts = [
        masks,
        params["dw1_w"].astype(jnp.float32),
        params["dw2_w"].astype(jnp.float32),
        pw1_w.astype(jnp.bfloat16),
        pw2_w.astype(jnp.bfloat16),
        res_w.astype(jnp.bfloat16),
        params["se_w1"].astype(jnp.float32),
        params["se_w2"].astype(jnp.float32),
        biases,
        seg_avg,
        seg_ones,
    ]

    # ---- batch fusion: (B, C_in, L) -> (C_in, B*L) lane-dense slab
    x2 = jnp.transpose(x, (1, 0, 2)).reshape(C_in, B * L)

    def const_spec(a):
        return pl.BlockSpec(a.shape, lambda i: (0, 0))

    in_specs = [pl.BlockSpec((C_in, N), lambda i: (0, i))] + [const_spec(a) for a in consts]
    out_specs = pl.BlockSpec((C_out, N), lambda i: (0, i))

    kernel = functools.partial(
        xception_block_kernel, K=K, pad=pad, dilation=dilation, N=N)

    # Explicit VMEM limit: double-buffered tiles + weights, generous margin, but
    # capped well under v7x's 64 MiB physical VMEM (128 MiB on v5e/v6e).
    need = 2 * (C_in * N * 4 + C_out * N * 4) \
        + sum(int(np.prod(a.shape)) * 4 for a in consts)
    vmem_limit = int(min(48 << 20, max(4 * need, 16 << 20)))

    out2 = pl.pallas_call(
        kernel,
        out_shape=jax.ShapeDtypeStruct((C_out, B * L), x.dtype),
        grid=(B // Bt,),
        in_specs=in_specs,
        out_specs=out_specs,
        compiler_params=pltpu.CompilerParams(
            dimension_semantics=("parallel",),
            vmem_limit_bytes=vmem_limit),
    )(x2, *consts)

    return out2.reshape(C_out, B, L).transpose(1, 0, 2)


# --------------------------------------------------------------------------
# Pure-JAX reference (unfolded math, PyTorch-faithful) for correctness check.
# --------------------------------------------------------------------------
def ref_forward(x, params, *, kernel_size=15, dilation=1):
    K = kernel_size
    pad = (K - 1) // 2 * dilation
    eps = 1e-5
    B, C_in, L = x.shape

    def bn(h, prefix):
        g, b = params[prefix + "_gamma"], params[prefix + "_beta"]
        m, v = params[prefix + "_mean"], params[prefix + "_var"]
        s = g / jnp.sqrt(v + eps)
        return h * s[None, :, None] + (b - m * s)[None, :, None]

    def depthwise(h, w, bias):
        hp = jnp.pad(h, ((0, 0), (0, 0), (pad, pad)))
        acc = jnp.zeros_like(h)
        for t in range(K):
            acc = acc + w[None, :, t, None] * hp[:, :, t * dilation: t * dilation + L]
        return acc + bias[None, :, None]

    def pointwise(h, w, bias):
        return jnp.einsum("oc,bcl->bol", w, h) + bias[None, :, None]

    residual = jnp.einsum("oc,bcl->bol", params["res_w"], x) \
        + params["res_b"][None, :, None]
    residual = bn(residual, "bnr")

    h = depthwise(x, params["dw1_w"], params["dw1_b"])
    h = pointwise(h, params["pw1_w"], params["pw1_b"])
    h = jnp.maximum(bn(h, "bn1"), 0.0)

    h = depthwise(h, params["dw2_w"], params["dw2_b"])
    h = pointwise(h, params["pw2_w"], params["pw2_b"])
    h = bn(h, "bn2")

    y = jnp.mean(h, axis=-1)                              # (B, C_out)
    y = jnp.maximum(y @ params["se_w1"].T, 0.0)
    y = jax.nn.sigmoid(y @ params["se_w2"].T)
    h = h * y[:, :, None]

    return jnp.maximum(h + residual, 0.0)


# --------------------------------------------------------------------------
def make_params(key, C_in, C_out, K, reduction=16):
    C_hid = C_out // reduction
    ks = jax.random.split(key, 16)
    u = lambda k, shape, scale=0.2: (jax.random.uniform(k, shape, jnp.float32) - 0.5) * 2 * scale
    p = {
        "dw1_w": u(ks[0], (C_in, K)),
        "dw1_b": u(ks[1], (C_in,)),
        "pw1_w": u(ks[2], (C_out, C_in)),
        "pw1_b": u(ks[3], (C_out,)),
        "dw2_w": u(ks[4], (C_out, K)),
        "dw2_b": u(ks[5], (C_out,)),
        "pw2_w": u(ks[6], (C_out, C_out)),
        "pw2_b": u(ks[7], (C_out,)),
        "se_w1": u(ks[8], (C_hid, C_out)),
        "se_w2": u(ks[9], (C_out, C_hid)),
        "res_w": u(ks[10], (C_out, C_in)),
        "res_b": u(ks[11], (C_out,)),
    }
    for i, prefix in enumerate(["bn1", "bn2", "bnr"]):
        kk = jax.random.split(ks[12 + i], 4)
        p[prefix + "_gamma"] = 1.0 + u(kk[0], (C_out,), 0.1)
        p[prefix + "_beta"] = u(kk[1], (C_out,), 0.1)
        p[prefix + "_mean"] = u(kk[2], (C_out,), 0.1)
        p[prefix + "_var"] = 1.0 + u(kk[3], (C_out,), 0.3)
    return p


if __name__ == "__main__":
    key = jax.random.PRNGKey(0)
    kx, kp, kx2 = jax.random.split(key, 3)

    B, C_in, C_out, L, K = 2, 16, 32, 128, 15
    params = make_params(kp, C_in, C_out, K)

    # Config 1: B=2 -> Bt=1, grid=(2,)
    x = jax.random.normal(kx, (B, C_in, L), jnp.float32)
    out = jax.block_until_ready(xception_block(x, params, kernel_size=K, dilation=1))
    ref = jax.block_until_ready(ref_forward(x, params, kernel_size=K, dilation=1))
    # bf16 MXU operands with f32 accumulation -> slightly loosened tolerance.
    np.testing.assert_allclose(np.asarray(out), np.asarray(ref), rtol=2e-2, atol=2e-2)

    # Config 2: B=8 -> Bt=4 (fused (C, 4*L) slabs), grid=(2,); exercises
    # cross-segment masking and the batched SE path.
    x_big = jax.random.normal(kx2, (8, C_in, L), jnp.float32)
    out_big = jax.block_until_ready(xception_block(x_big, params, kernel_size=K, dilation=1))
    ref_big = jax.block_until_ready(ref_forward(x_big, params, kernel_size=K, dilation=1))
    np.testing.assert_allclose(np.asarray(out_big), np.asarray(ref_big), rtol=2e-2, atol=2e-2)

    print("KERNEL_OK")
</pallas_src>

<mosaic_0001>
module attributes {stable_mosaic.version = 11 : i64} {
  func.func @xception_block_kernel(%arg0: i32, %arg1: memref<16x128xf32, #tpu.memory_space<vmem>>, %arg2: memref<15x128xf32, #tpu.memory_space<vmem>>, %arg3: memref<16x15xf32, #tpu.memory_space<vmem>>, %arg4: memref<32x15xf32, #tpu.memory_space<vmem>>, %arg5: memref<32x16xbf16, #tpu.memory_space<vmem>>, %arg6: memref<32x32xbf16, #tpu.memory_space<vmem>>, %arg7: memref<32x16xbf16, #tpu.memory_space<vmem>>, %arg8: memref<2x32xf32, #tpu.memory_space<vmem>>, %arg9: memref<32x2xf32, #tpu.memory_space<vmem>>, %arg10: memref<32x3xf32, #tpu.memory_space<vmem>>, %arg11: memref<128x1xf32, #tpu.memory_space<vmem>>, %arg12: memref<1x128xf32, #tpu.memory_space<vmem>>, %arg13: memref<32x128xf32, #tpu.memory_space<vmem>>) attributes {dimension_semantics = [#tpu.dimension_semantics<parallel>], iteration_bounds = array<i64: 2>, scalar_prefetch = 0 : i64, scratch_operands = 0 : i64, tpu.core_type = #tpu.core_type<tc>, window_params = [{transform_indices = @transform_0, window_bounds = array<i64: 16, 128>}, {pipeline_mode = #tpu.pipeline_mode<synchronous>, transform_indices = @transform_1, window_bounds = array<i64: 15, 128>}, {pipeline_mode = #tpu.pipeline_mode<synchronous>, transform_indices = @transform_2, window_bounds = array<i64: 16, 15>}, {pipeline_mode = #tpu.pipeline_mode<synchronous>, transform_indices = @transform_3, window_bounds = array<i64: 32, 15>}, {pipeline_mode = #tpu.pipeline_mode<synchronous>, transform_indices = @transform_4, window_bounds = array<i64: 32, 16>}, {pipeline_mode = #tpu.pipeline_mode<synchronous>, transform_indices = @transform_5, window_bounds = array<i64: 32, 32>}, {pipeline_mode = #tpu.pipeline_mode<synchronous>, transform_indices = @transform_6, window_bounds = array<i64: 32, 16>}, {pipeline_mode = #tpu.pipeline_mode<synchronous>, transform_indices = @transform_7, window_bounds = array<i64: 2, 32>}, {pipeline_mode = #tpu.pipeline_mode<synchronous>, transform_indices = @transform_8, window_bounds = array<i64: 32, 2>}, {pipeline_mode = #tpu.pipeline_mode<synchronous>, transform_indices = @transform_9, window_bounds = array<i64: 32, 3>}, {pipeline_mode = #tpu.pipeline_mode<synchronous>, transform_indices = @transform_10, window_bounds = array<i64: 128, 1>}, {pipeline_mode = #tpu.pipeline_mode<synchronous>, transform_indices = @transform_11, window_bounds = array<i64: 1, 128>}, {transform_indices = @transform_12, window_bounds = array<i64: 32, 128>}]} {
    %c0 = arith.constant 0 : index
    %c0_0 = arith.constant 0 : index
    %0 = vector.load %arg1[%c0, %c0_0] : memref<16x128xf32, #tpu.memory_space<vmem>>, vector<16x128xf32>
    %c0_1 = arith.constant 0 : index
    %c0_2 = arith.constant 0 : index
    %1 = vector.load %arg3[%c0_1, %c0_2] : memref<16x15xf32, #tpu.memory_space<vmem>>, vector<16x15xf32>
    %c0_3 = arith.constant 0 : index
    %c0_4 = arith.constant 0 : index
    %2 = vector.load %arg4[%c0_3, %c0_4] : memref<32x15xf32, #tpu.memory_space<vmem>>, vector<32x15xf32>
    %c0_5 = arith.constant 0 : index
    %c0_6 = arith.constant 0 : index
    %3 = vector.load %arg10[%c0_5, %c0_6] : memref<32x3xf32, #tpu.memory_space<vmem>>, vector<32x1xf32>
    %c0_7 = arith.constant 0 : index
    %c1 = arith.constant 1 : index
    %4 = vector.load %arg10[%c0_7, %c1] : memref<32x3xf32, #tpu.memory_space<vmem>>, vector<32x1xf32>
    %c0_8 = arith.constant 0 : index
    %c2 = arith.constant 2 : index
    %5 = vector.load %arg10[%c0_8, %c2] : memref<32x3xf32, #tpu.memory_space<vmem>>, vector<32x1xf32>
    %c7_i32 = arith.constant 7 : i32
    %6 = tpu.dynamic_rotate %0 by %c7_i32 dim 1 : vector<16x128xf32>, i32 -> vector<16x128xf32>
    %c0_9 = arith.constant 0 : index
    %c0_10 = arith.constant 0 : index
    %7 = vector.load %arg2[%c0_9, %c0_10] : memref<15x128xf32, #tpu.memory_space<vmem>>, vector<1x128xf32>
    %8 = vector.broadcast %7 : vector<1x128xf32> to vector<16x128xf32>
    %9 = arith.mulf %6, %8 : vector<16x128xf32>
    %10 = vector.extract_strided_slice %1 {offsets = [0, 0], sizes = [16, 1], strides = [1, 1]} : vector<16x15xf32> to vector<16x1xf32>
    %11 = vector.broadcast %10 : vector<16x1xf32> to vector<16x128xf32>
    %12 = arith.mulf %11, %9 : vector<16x128xf32>
    %c6_i32 = arith.constant 6 : i32
    %13 = tpu.dynamic_rotate %0 by %c6_i32 dim 1 : vector<16x128xf32>, i32 -> vector<16x128xf32>
    %c1_11 = arith.constant 1 : index
    %c0_12 = arith.constant 0 : index
    %14 = vector.load %arg2[%c1_11, %c0_12] : memref<15x128xf32, #tpu.memory_space<vmem>>, vector<1x128xf32>
    %15 = vector.broadcast %14 : vector<1x128xf32> to vector<16x128xf32>
    %16 = arith.mulf %13, %15 : vector<16x128xf32>
    %17 = vector.extract_strided_slice %1 {offsets = [0, 1], sizes = [16, 1], strides = [1, 1]} : vector<16x15xf32> to vector<16x1xf32>
    %18 = vector.broadcast %17 : vector<16x1xf32> to vector<16x128xf32>
    %19 = arith.mulf %18, %16 : vector<16x128xf32>
    %20 = arith.addf %12, %19 : vector<16x128xf32>
    %c5_i32 = arith.constant 5 : i32
    %21 = tpu.dynamic_rotate %0 by %c5_i32 dim 1 : vector<16x128xf32>, i32 -> vector<16x128xf32>
    %c2_13 = arith.constant 2 : index
    %c0_14 = arith.constant 0 : index
    %22 = vector.load %arg2[%c2_13, %c0_14] : memref<15x128xf32, #tpu.memory_space<vmem>>, vector<1x128xf32>
    %23 = vector.broadcast %22 : vector<1x128xf32> to vector<16x128xf32>
    %24 = arith.mulf %21, %23 : vector<16x128xf32>
    %25 = vector.extract_strided_slice %1 {offsets = [0, 2], sizes = [16, 1], strides = [1, 1]} : vector<16x15xf32> to vector<16x1xf32>
    %26 = vector.broadcast %25 : vector<16x1xf32> to vector<16x128xf32>
    %27 = arith.mulf %26, %24 : vector<16x128xf32>
    %28 = arith.addf %20, %27 : vector<16x128xf32>
    %c4_i32 = arith.constant 4 : i32
    %29 = tpu.dynamic_rotate %0 by %c4_i32 dim 1 : vector<16x128xf32>, i32 -> vector<16x128xf32>
    %c3 = arith.constant 3 : index
    %c0_15 = arith.constant 0 : index
    %30 = vector.load %arg2[%c3, %c0_15] : memref<15x128xf32, #tpu.memory_space<vmem>>, vector<1x128xf32>
    %31 = vector.broadcast %30 : vector<1x128xf32> to vector<16x128xf32>
    %32 = arith.mulf %29, %31 : vector<16x128xf32>
    %33 = vector.extract_strided_slice %1 {offsets = [0, 3], sizes = [16, 1], strides = [1, 1]} : vector<16x15xf32> to vector<16x1xf32>
    %34 = vector.broadcast %33 : vector<16x1xf32> to vector<16x128xf32>
    %35 = arith.mulf %34, %32 : vector<16x128xf32>
    %36 = arith.addf %28, %35 : vector<16x128xf32>
    %c3_i32 = arith.constant 3 : i32
    %37 = tpu.dynamic_rotate %0 by %c3_i32 dim 1 : vector<16x128xf32>, i32 -> vector<16x128xf32>
    %c4 = arith.constant 4 : index
    %c0_16 = arith.constant 0 : index
    %38 = vector.load %arg2[%c4, %c0_16] : memref<15x128xf32, #tpu.memory_space<vmem>>, vector<1x128xf32>
    %39 = vector.broadcast %38 : vector<1x128xf32> to vector<16x128xf32>
    %40 = arith.mulf %37, %39 : vector<16x128xf32>
    %41 = vector.extract_strided_slice %1 {offsets = [0, 4], sizes = [16, 1], strides = [1, 1]} : vector<16x15xf32> to vector<16x1xf32>
    %42 = vector.broadcast %41 : vector<16x1xf32> to vector<16x128xf32>
    %43 = arith.mulf %42, %40 : vector<16x128xf32>
    %44 = arith.addf %36, %43 : vector<16x128xf32>
    %c2_i32 = arith.constant 2 : i32
    %45 = tpu.dynamic_rotate %0 by %c2_i32 dim 1 : vector<16x128xf32>, i32 -> vector<16x128xf32>
    %c5 = arith.constant 5 : index
    %c0_17 = arith.constant 0 : index
    %46 = vector.load %arg2[%c5, %c0_17] : memref<15x128xf32, #tpu.memory_space<vmem>>, vector<1x128xf32>
    %47 = vector.broadcast %46 : vector<1x128xf32> to vector<16x128xf32>
    %48 = arith.mulf %45, %47 : vector<16x128xf32>
    %49 = vector.extract_strided_slice %1 {offsets = [0, 5], sizes = [16, 1], strides = [1, 1]} : vector<16x15xf32> to vector<16x1xf32>
    %50 = vector.broadcast %49 : vector<16x1xf32> to vector<16x128xf32>
    %51 = arith.mulf %50, %48 : vector<16x128xf32>
    %52 = arith.addf %44, %51 : vector<16x128xf32>
    %c1_i32 = arith.constant 1 : i32
    %53 = tpu.dynamic_rotate %0 by %c1_i32 dim 1 : vector<16x128xf32>, i32 -> vector<16x128xf32>
    %c6 = arith.constant 6 : index
    %c0_18 = arith.constant 0 : index
    %54 = vector.load %arg2[%c6, %c0_18] : memref<15x128xf32, #tpu.memory_space<vmem>>, vector<1x128xf32>
    %55 = vector.broadcast %54 : vector<1x128xf32> to vector<16x128xf32>
    %56 = arith.mulf %53, %55 : vector<16x128xf32>
    %57 = vector.extract_strided_slice %1 {offsets = [0, 6], sizes = [16, 1], strides = [1, 1]} : vector<16x15xf32> to vector<16x1xf32>
    %58 = vector.broadcast %57 : vector<16x1xf32> to vector<16x128xf32>
    %59 = arith.mulf %58, %56 : vector<16x128xf32>
    %60 = arith.addf %52, %59 : vector<16x128xf32>
    %61 = vector.extract_strided_slice %1 {offsets = [0, 7], sizes = [16, 1], strides = [1, 1]} : vector<16x15xf32> to vector<16x1xf32>
    %62 = vector.broadcast %61 : vector<16x1xf32> to vector<16x128xf32>
    %63 = arith.mulf %62, %0 : vector<16x128xf32>
    %64 = arith.addf %60, %63 : vector<16x128xf32>
    %c127_i32 = arith.constant 127 : i32
    %65 = tpu.dynamic_rotate %0 by %c127_i32 dim 1 : vector<16x128xf32>, i32 -> vector<16x128xf32>
    %c8 = arith.constant 8 : index
    %c0_19 = arith.constant 0 : index
    %66 = vector.load %arg2[%c8, %c0_19] : memref<15x128xf32, #tpu.memory_space<vmem>>, vector<1x128xf32>
    %67 = vector.broadcast %66 : vector<1x128xf32> to vector<16x128xf32>
    %68 = arith.mulf %65, %67 : vector<16x128xf32>
    %69 = vector.extract_strided_slice %1 {offsets = [0, 8], sizes = [16, 1], strides = [1, 1]} : vector<16x15xf32> to vector<16x1xf32>
    %70 = vector.broadcast %69 : vector<16x1xf32> to vector<16x128xf32>
    %71 = arith.mulf %70, %68 : vector<16x128xf32>
    %72 = arith.addf %64, %71 : vector<16x128xf32>
    %c126_i32 = arith.constant 126 : i32
    %73 = tpu.dynamic_rotate %0 by %c126_i32 dim 1 : vector<16x128xf32>, i32 -> vector<16x128xf32>
    %c9 = arith.constant 9 : index
    %c0_20 = arith.constant 0 : index
    %74 = vector.load %arg2[%c9, %c0_20] : memref<15x128xf32, #tpu.memory_space<vmem>>, vector<1x128xf32>
    %75 = vector.broadcast %74 : vector<1x128xf32> to vector<16x128xf32>
    %76 = arith.mulf %73, %75 : vector<16x128xf32>
    %77 = vector.extract_strided_slice %1 {offsets = [0, 9], sizes = [16, 1], strides = [1, 1]} : vector<16x15xf32> to vector<16x1xf32>
    %78 = vector.broadcast %77 : vector<16x1xf32> to vector<16x128xf32>
    %79 = arith.mulf %78, %76 : vector<16x128xf32>
    %80 = arith.addf %72, %79 : vector<16x128xf32>
    %c125_i32 = arith.constant 125 : i32
    %81 = tpu.dynamic_rotate %0 by %c125_i32 dim 1 : vector<16x128xf32>, i32 -> vector<16x128xf32>
    %c10 = arith.constant 10 : index
    %c0_21 = arith.constant 0 : index
    %82 = vector.load %arg2[%c10, %c0_21] : memref<15x128xf32, #tpu.memory_space<vmem>>, vector<1x128xf32>
    %83 = vector.broadcast %82 : vector<1x128xf32> to vector<16x128xf32>
    %84 = arith.mulf %81, %83 : vector<16x128xf32>
    %85 = vector.extract_strided_slice %1 {offsets = [0, 10], sizes = [16, 1], strides = [1, 1]} : vector<16x15xf32> to vector<16x1xf32>
    %86 = vector.broadcast %85 : vector<16x1xf32> to vector<16x128xf32>
    %87 = arith.mulf %86, %84 : vector<16x128xf32>
    %88 = arith.addf %80, %87 : vector<16x128xf32>
    %c124_i32 = arith.constant 124 : i32
    %89 = tpu.dynamic_rotate %0 by %c124_i32 dim 1 : vector<16x128xf32>, i32 -> vector<16x128xf32>
    %c11 = arith.constant 11 : index
    %c0_22 = arith.constant 0 : index
    %90 = vector.load %arg2[%c11, %c0_22] : memref<15x128xf32, #tpu.memory_space<vmem>>, vector<1x128xf32>
    %91 = vector.broadcast %90 : vector<1x128xf32> to vector<16x128xf32>
    %92 = arith.mulf %89, %91 : vector<16x128xf32>
    %93 = vector.extract_strided_slice %1 {offsets = [0, 11], sizes = [16, 1], strides = [1, 1]} : vector<16x15xf32> to vector<16x1xf32>
    %94 = vector.broadcast %93 : vector<16x1xf32> to vector<16x128xf32>
    %95 = arith.mulf %94, %92 : vector<16x128xf32>
    %96 = arith.addf %88, %95 : vector<16x128xf32>
    %c123_i32 = arith.constant 123 : i32
    %97 = tpu.dynamic_rotate %0 by %c123_i32 dim 1 : vector<16x128xf32>, i32 -> vector<16x128xf32>
    %c12 = arith.constant 12 : index
    %c0_23 = arith.constant 0 : index
    %98 = vector.load %arg2[%c12, %c0_23] : memref<15x128xf32, #tpu.memory_space<vmem>>, vector<1x128xf32>
    %99 = vector.broadcast %98 : vector<1x128xf32> to vector<16x128xf32>
    %100 = arith.mulf %97, %99 : vector<16x128xf32>
    %101 = vector.extract_strided_slice %1 {offsets = [0, 12], sizes = [16, 1], strides = [1, 1]} : vector<16x15xf32> to vector<16x1xf32>
    %102 = vector.broadcast %101 : vector<16x1xf32> to vector<16x128xf32>
    %103 = arith.mulf %102, %100 : vector<16x128xf32>
    %104 = arith.addf %96, %103 : vector<16x128xf32>
    %c122_i32 = arith.constant 122 : i32
    %105 = tpu.dynamic_rotate %0 by %c122_i32 dim 1 : vector<16x128xf32>, i32 -> vector<16x128xf32>
    %c13 = arith.constant 13 : index
    %c0_24 = arith.constant 0 : index
    %106 = vector.load %arg2[%c13, %c0_24] : memref<15x128xf32, #tpu.memory_space<vmem>>, vector<1x128xf32>
    %107 = vector.broadcast %106 : vector<1x128xf32> to vector<16x128xf32>
    %108 = arith.mulf %105, %107 : vector<16x128xf32>
    %109 = vector.extract_strided_slice %1 {offsets = [0, 13], sizes = [16, 1], strides = [1, 1]} : vector<16x15xf32> to vector<16x1xf32>
    %110 = vector.broadcast %109 : vector<16x1xf32> to vector<16x128xf32>
    %111 = arith.mulf %110, %108 : vector<16x128xf32>
    %112 = arith.addf %104, %111 : vector<16x128xf32>
    %c121_i32 = arith.constant 121 : i32
    %113 = tpu.dynamic_rotate %0 by %c121_i32 dim 1 : vector<16x128xf32>, i32 -> vector<16x128xf32>
    %c14 = arith.constant 14 : index
    %c0_25 = arith.constant 0 : index
    %114 = vector.load %arg2[%c14, %c0_25] : memref<15x128xf32, #tpu.memory_space<vmem>>, vector<1x128xf32>
    %115 = vector.broadcast %114 : vector<1x128xf32> to vector<16x128xf32>
    %116 = arith.mulf %113, %115 : vector<16x128xf32>
    %117 = vector.extract_strided_slice %1 {offsets = [0, 14], sizes = [16, 1], strides = [1, 1]} : vector<16x15xf32> to vector<16x1xf32>
    %118 = vector.broadcast %117 : vector<16x1xf32> to vector<16x128xf32>
    %119 = arith.mulf %118, %116 : vector<16x128xf32>
    %120 = arith.addf %112, %119 : vector<16x128xf32>
    %c0_26 = arith.constant 0 : index
    %c0_27 = arith.constant 0 : index
    %121 = vector.load %arg5[%c0_26, %c0_27] : memref<32x16xbf16, #tpu.memory_space<vmem>>, vector<32x16xbf16>
    %122 = arith.truncf %120 : vector<16x128xf32> to vector<16x128xbf16>
    %cst = arith.constant dense<0.000000e+00> : vector<32x128xf32>
    %123 = tpu.matmul %121, %122, %cst {dimension_numbers = #tpu.dot_dimension_numbers<[1], [0], [0], [1], [0, 0, 1, 1], [], []>} : vector<32x16xbf16>, vector<16x128xbf16>, vector<32x128xf32> -> vector<32x128xf32>
    %124 = vector.broadcast %3 : vector<32x1xf32> to vector<32x128xf32>
    %125 = arith.addf %123, %124 : vector<32x128xf32>
    %cst_28 = arith.constant 0.000000e+00 : f32
    %126 = vector.broadcast %cst_28 : f32 to vector<32x128xf32>
    %127 = arith.maximumf %125, %126 : vector<32x128xf32>
    %c7_i32_29 = arith.constant 7 : i32
    %128 = tpu.dynamic_rotate %127 by %c7_i32_29 dim 1 : vector<32x128xf32>, i32 -> vector<32x128xf32>
    %c0_30 = arith.constant 0 : index
    %c0_31 = arith.constant 0 : index
    %129 = vector.load %arg2[%c0_30, %c0_31] : memref<15x128xf32, #tpu.memory_space<vmem>>, vector<1x128xf32>
    %130 = vector.broadcast %129 : vector<1x128xf32> to vector<32x128xf32>
    %131 = arith.mulf %128, %130 : vector<32x128xf32>
    %132 = vector.extract_strided_slice %2 {offsets = [0, 0], sizes = [32, 1], strides = [1, 1]} : vector<32x15xf32> to vector<32x1xf32>
    %133 = vector.broadcast %132 : vector<32x1xf32> to vector<32x128xf32>
    %134 = arith.mulf %133, %131 : vector<32x128xf32>
    %c6_i32_32 = arith.constant 6 : i32
    %135 = tpu.dynamic_rotate %127 by %c6_i32_32 dim 1 : vector<32x128xf32>, i32 -> vector<32x128xf32>
    %c1_33 = arith.constant 1 : index
    %c0_34 = arith.constant 0 : index
    %136 = vector.load %arg2[%c1_33, %c0_34] : memref<15x128xf32, #tpu.memory_space<vmem>>, vector<1x128xf32>
    %137 = vector.broadcast %136 : vector<1x128xf32> to vector<32x128xf32>
    %138 = arith.mulf %135, %137 : vector<32x128xf32>
    %139 = vector.extract_strided_slice %2 {offsets = [0, 1], sizes = [32, 1], strides = [1, 1]} : vector<32x15xf32> to vector<32x1xf32>
    %140 = vector.broadcast %139 : vector<32x1xf32> to vector<32x128xf32>
    %141 = arith.mulf %140, %138 : vector<32x128xf32>
    %142 = arith.addf %134, %141 : vector<32x128xf32>
    %c5_i32_35 = arith.constant 5 : i32
    %143 = tpu.dynamic_rotate %127 by %c5_i32_35 dim 1 : vector<32x128xf32>, i32 -> vector<32x128xf32>
    %c2_36 = arith.constant 2 : index
    %c0_37 = arith.constant 0 : index
    %144 = vector.load %arg2[%c2_36, %c0_37] : memref<15x128xf32, #tpu.memory_space<vmem>>, vector<1x128xf32>
    %145 = vector.broadcast %144 : vector<1x128xf32> to vector<32x128xf32>
    %146 = arith.mulf %143, %145 : vector<32x128xf32>
    %147 = vector.extract_strided_slice %2 {offsets = [0, 2], sizes = [32, 1], strides = [1, 1]} : vector<32x15xf32> to vector<32x1xf32>
    %148 = vector.broadcast %147 : vector<32x1xf32> to vector<32x128xf32>
    %149 = arith.mulf %148, %146 : vector<32x128xf32>
    %150 = arith.addf %142, %149 : vector<32x128xf32>
    %c4_i32_38 = arith.constant 4 : i32
    %151 = tpu.dynamic_rotate %127 by %c4_i32_38 dim 1 : vector<32x128xf32>, i32 -> vector<32x128xf32>
    %c3_39 = arith.constant 3 : index
    %c0_40 = arith.constant 0 : index
    %152 = vector.load %arg2[%c3_39, %c0_40] : memref<15x128xf32, #tpu.memory_space<vmem>>, vector<1x128xf32>
    %153 = vector.broadcast %152 : vector<1x128xf32> to vector<32x128xf32>
    %154 = arith.mulf %151, %153 : vector<32x128xf32>
    %155 = vector.extract_strided_slice %2 {offsets = [0, 3], sizes = [32, 1], strides = [1, 1]} : vector<32x15xf32> to vector<32x1xf32>
    %156 = vector.broadcast %155 : vector<32x1xf32> to vector<32x128xf32>
    %157 = arith.mulf %156, %154 : vector<32x128xf32>
    %158 = arith.addf %150, %157 : vector<32x128xf32>
    %c3_i32_41 = arith.constant 3 : i32
    %159 = tpu.dynamic_rotate %127 by %c3_i32_41 dim 1 : vector<32x128xf32>, i32 -> vector<32x128xf32>
    %c4_42 = arith.constant 4 : index
    %c0_43 = arith.constant 0 : index
    %160 = vector.load %arg2[%c4_42, %c0_43] : memref<15x128xf32, #tpu.memory_space<vmem>>, vector<1x128xf32>
    %161 = vector.broadcast %160 : vector<1x128xf32> to vector<32x128xf32>
    %162 = arith.mulf %159, %161 : vector<32x128xf32>
    %163 = vector.extract_strided_slice %2 {offsets = [0, 4], sizes = [32, 1], strides = [1, 1]} : vector<32x15xf32> to vector<32x1xf32>
    %164 = vector.broadcast %163 : vector<32x1xf32> to vector<32x128xf32>
    %165 = arith.mulf %164, %162 : vector<32x128xf32>
    %166 = arith.addf %158, %165 : vector<32x128xf32>
    %c2_i32_44 = arith.constant 2 : i32
    %167 = tpu.dynamic_rotate %127 by %c2_i32_44 dim 1 : vector<32x128xf32>, i32 -> vector<32x128xf32>
    %c5_45 = arith.constant 5 : index
    %c0_46 = arith.constant 0 : index
    %168 = vector.load %arg2[%c5_45, %c0_46] : memref<15x128xf32, #tpu.memory_space<vmem>>, vector<1x128xf32>
    %169 = vector.broadcast %168 : vector<1x128xf32> to vector<32x128xf32>
    %170 = arith.mulf %167, %169 : vector<32x128xf32>
    %171 = vector.extract_strided_slice %2 {offsets = [0, 5], sizes = [32, 1], strides = [1, 1]} : vector<32x15xf32> to vector<32x1xf32>
    %172 = vector.broadcast %171 : vector<32x1xf32> to vector<32x128xf32>
    %173 = arith.mulf %172, %170 : vector<32x128xf32>
    %174 = arith.addf %166, %173 : vector<32x128xf32>
    %c1_i32_47 = arith.constant 1 : i32
    %175 = tpu.dynamic_rotate %127 by %c1_i32_47 dim 1 : vector<32x128xf32>, i32 -> vector<32x128xf32>
    %c6_48 = arith.constant 6 : index
    %c0_49 = arith.constant 0 : index
    %176 = vector.load %arg2[%c6_48, %c0_49] : memref<15x128xf32, #tpu.memory_space<vmem>>, vector<1x128xf32>
    %177 = vector.broadcast %176 : vector<1x128xf32> to vector<32x128xf32>
    %178 = arith.mulf %175, %177 : vector<32x128xf32>
    %179 = vector.extract_strided_slice %2 {offsets = [0, 6], sizes = [32, 1], strides = [1, 1]} : vector<32x15xf32> to vector<32x1xf32>
    %180 = vector.broadcast %179 : vector<32x1xf32> to vector<32x128xf32>
    %181 = arith.mulf %180, %178 : vector<32x128xf32>
    %182 = arith.addf %174, %181 : vector<32x128xf32>
    %183 = vector.extract_strided_slice %2 {offsets = [0, 7], sizes = [32, 1], strides = [1, 1]} : vector<32x15xf32> to vector<32x1xf32>
    %184 = vector.broadcast %183 : vector<32x1xf32> to vector<32x128xf32>
    %185 = arith.mulf %184, %127 : vector<32x128xf32>
    %186 = arith.addf %182, %185 : vector<32x128xf32>
    %c127_i32_50 = arith.constant 127 : i32
    %187 = tpu.dynamic_rotate %127 by %c127_i32_50 dim 1 : vector<32x128xf32>, i32 -> vector<32x128xf32>
    %c8_51 = arith.constant 8 : index
    %c0_52 = arith.constant 0 : index
    %188 = vector.load %arg2[%c8_51, %c0_52] : memref<15x128xf32, #tpu.memory_space<vmem>>, vector<1x128xf32>
    %189 = vector.broadcast %188 : vector<1x128xf32> to vector<32x128xf32>
    %190 = arith.mulf %187, %189 : vector<32x128xf32>
    %191 = vector.extract_strided_slice %2 {offsets = [0, 8], sizes = [32, 1], strides = [1, 1]} : vector<32x15xf32> to vector<32x1xf32>
    %192 = vector.broadcast %191 : vector<32x1xf32> to vector<32x128xf32>
    %193 = arith.mulf %192, %190 : vector<32x128xf32>
    %194 = arith.addf %186, %193 : vector<32x128xf32>
    %c126_i32_53 = arith.constant 126 : i32
    %195 = tpu.dynamic_rotate %127 by %c126_i32_53 dim 1 : vector<32x128xf32>, i32 -> vector<32x128xf32>
    %c9_54 = arith.constant 9 : index
    %c0_55 = arith.constant 0 : index
    %196 = vector.load %arg2[%c9_54, %c0_55] : memref<15x128xf32, #tpu.memory_space<vmem>>, vector<1x128xf32>
    %197 = vector.broadcast %196 : vector<1x128xf32> to vector<32x128xf32>
    %198 = arith.mulf %195, %197 : vector<32x128xf32>
    %199 = vector.extract_strided_slice %2 {offsets = [0, 9], sizes = [32, 1], strides = [1, 1]} : vector<32x15xf32> to vector<32x1xf32>
    %200 = vector.broadcast %199 : vector<32x1xf32> to vector<32x128xf32>
    %201 = arith.mulf %200, %198 : vector<32x128xf32>
    %202 = arith.addf %194, %201 : vector<32x128xf32>
    %c125_i32_56 = arith.constant 125 : i32
    %203 = tpu.dynamic_rotate %127 by %c125_i32_56 dim 1 : vector<32x128xf32>, i32 -> vector<32x128xf32>
    %c10_57 = arith.constant 10 : index
    %c0_58 = arith.constant 0 : index
    %204 = vector.load %arg2[%c10_57, %c0_58] : memref<15x128xf32, #tpu.memory_space<vmem>>, vector<1x128xf32>
    %205 = vector.broadcast %204 : vector<1x128xf32> to vector<32x128xf32>
    %206 = arith.mulf %203, %205 : vector<32x128xf32>
    %207 = vector.extract_strided_slice %2 {offsets = [0, 10], sizes = [32, 1], strides = [1, 1]} : vector<32x15xf32> to vector<32x1xf32>
    %208 = vector.broadcast %207 : vector<32x1xf32> to vector<32x128xf32>
    %209 = arith.mulf %208, %206 : vector<32x128xf32>
    %210 = arith.addf %202, %209 : vector<32x128xf32>
    %c124_i32_59 = arith.constant 124 : i32
    %211 = tpu.dynamic_rotate %127 by %c124_i32_59 dim 1 : vector<32x128xf32>, i32 -> vector<32x128xf32>
    %c11_60 = arith.constant 11 : index
    %c0_61 = arith.constant 0 : index
    %212 = vector.load %arg2[%c11_60, %c0_61] : memref<15x128xf32, #tpu.memory_space<vmem>>, vector<1x128xf32>
    %213 = vector.broadcast %212 : vector<1x128xf32> to vector<32x128xf32>
    %214 = arith.mulf %211, %213 : vector<32x128xf32>
    %215 = vector.extract_strided_slice %2 {offsets = [0, 11], sizes = [32, 1], strides = [1, 1]} : vector<32x15xf32> to vector<32x1xf32>
    %216 = vector.broadcast %215 : vector<32x1xf32> to vector<32x128xf32>
    %217 = arith.mulf %216, %214 : vector<32x128xf32>
    %218 = arith.addf %210, %217 : vector<32x128xf32>
    %c123_i32_62 = arith.constant 123 : i32
    %219 = tpu.dynamic_rotate %127 by %c123_i32_62 dim 1 : vector<32x128xf32>, i32 -> vector<32x128xf32>
    %c12_63 = arith.constant 12 : index
    %c0_64 = arith.constant 0 : index
    %220 = vector.load %arg2[%c12_63, %c0_64] : memref<15x128xf32, #tpu.memory_space<vmem>>, vector<1x128xf32>
    %221 = vector.broadcast %220 : vector<1x128xf32> to vector<32x128xf32>
    %222 = arith.mulf %219, %221 : vector<32x128xf32>
    %223 = vector.extract_strided_slice %2 {offsets = [0, 12], sizes = [32, 1], strides = [1, 1]} : vector<32x15xf32> to vector<32x1xf32>
    %224 = vector.broadcast %223 : vector<32x1xf32> to vector<32x128xf32>
    %225 = arith.mulf %224, %222 : vector<32x128xf32>
    %226 = arith.addf %218, %225 : vector<32x128xf32>
    %c122_i32_65 = arith.constant 122 : i32
    %227 = tpu.dynamic_rotate %127 by %c122_i32_65 dim 1 : vector<32x128xf32>, i32 -> vector<32x128xf32>
    %c13_66 = arith.constant 13 : index
    %c0_67 = arith.constant 0 : index
    %228 = vector.load %arg2[%c13_66, %c0_67] : memref<15x128xf32, #tpu.memory_space<vmem>>, vector<1x128xf32>
    %229 = vector.broadcast %228 : vector<1x128xf32> to vector<32x128xf32>
    %230 = arith.mulf %227, %229 : vector<32x128xf32>
    %231 = vector.extract_strided_slice %2 {offsets = [0, 13], sizes = [32, 1], strides = [1, 1]} : vector<32x15xf32> to vector<32x1xf32>
    %232 = vector.broadcast %231 : vector<32x1xf32> to vector<32x128xf32>
    %233 = arith.mulf %232, %230 : vector<32x128xf32>
    %234 = arith.addf %226, %233 : vector<32x128xf32>
    %c121_i32_68 = arith.constant 121 : i32
    %235 = tpu.dynamic_rotate %127 by %c121_i32_68 dim 1 : vector<32x128xf32>, i32 -> vector<32x128xf32>
    %c14_69 = arith.constant 14 : index
    %c0_70 = arith.constant 0 : index
    %236 = vector.load %arg2[%c14_69, %c0_70] : memref<15x128xf32, #tpu.memory_space<vmem>>, vector<1x128xf32>
    %237 = vector.broadcast %236 : vector<1x128xf32> to vector<32x128xf32>
    %238 = arith.mulf %235, %237 : vector<32x128xf32>
    %239 = vector.extract_strided_slice %2 {offsets = [0, 14], sizes = [32, 1], strides = [1, 1]} : vector<32x15xf32> to vector<32x1xf32>
    %240 = vector.broadcast %239 : vector<32x1xf32> to vector<32x128xf32>
    %241 = arith.mulf %240, %238 : vector<32x128xf32>
    %242 = arith.addf %234, %241 : vector<32x128xf32>
    %c0_71 = arith.constant 0 : index
    %c0_72 = arith.constant 0 : index
    %243 = vector.load %arg6[%c0_71, %c0_72] : memref<32x32xbf16, #tpu.memory_space<vmem>>, vector<32x32xbf16>
    %244 = arith.truncf %242 : vector<32x128xf32> to vector<32x128xbf16>
    %cst_73 = arith.constant dense<0.000000e+00> : vector<32x128xf32>
    %245 = tpu.matmul %243, %244, %cst_73 {dimension_numbers = #tpu.dot_dimension_numbers<[1], [0], [0], [1], [0, 0, 1, 1], [], []>} : vector<32x32xbf16>, vector<32x128xbf16>, vector<32x128xf32> -> vector<32x128xf32>
    %246 = vector.broadcast %4 : vector<32x1xf32> to vector<32x128xf32>
    %247 = arith.addf %245, %246 : vector<32x128xf32>
    %c0_74 = arith.constant 0 : index
    %c0_75 = arith.constant 0 : index
    %248 = vector.load %arg11[%c0_74, %c0_75] : memref<128x1xf32, #tpu.memory_space<vmem>>, vector<128x1xf32>
    %cst_76 = arith.constant dense<0.000000e+00> : vector<32x1xf32>
    %249 = tpu.matmul %247, %248, %cst_76 {dimension_numbers = #tpu.dot_dimension_numbers<[1], [0], [0], [1], [0, 0, 1, 1], [], []>} : vector<32x128xf32>, vector<128x1xf32>, vector<32x1xf32> -> vector<32x1xf32>
    %c0_77 = arith.constant 0 : index
    %c0_78 = arith.constant 0 : index
    %250 = vector.load %arg8[%c0_77, %c0_78] : memref<2x32xf32, #tpu.memory_space<vmem>>, vector<2x32xf32>
    %cst_79 = arith.constant dense<0.000000e+00> : vector<2x1xf32>
    %251 = tpu.matmul %250, %249, %cst_79 {dimension_numbers = #tpu.dot_dimension_numbers<[1], [0], [0], [1], [0, 0, 1, 1], [], []>} : vector<2x32xf32>, vector<32x1xf32>, vector<2x1xf32> -> vector<2x1xf32>
    %cst_80 = arith.constant 0.000000e+00 : f32
    %252 = vector.broadcast %cst_80 : f32 to vector<2x1xf32>
    %253 = arith.maximumf %251, %252 : vector<2x1xf32>
    %c0_81 = arith.constant 0 : index
    %c0_82 = arith.constant 0 : index
    %254 = vector.load %arg9[%c0_81, %c0_82] : memref<32x2xf32, #tpu.memory_space<vmem>>, vector<32x2xf32>
    %cst_83 = arith.constant dense<0.000000e+00> : vector<32x1xf32>
    %255 = tpu.matmul %254, %253, %cst_83 {dimension_numbers = #tpu.dot_dimension_numbers<[1], [0], [0], [1], [0, 0, 1, 1], [], []>} : vector<32x2xf32>, vector<2x1xf32>, vector<32x1xf32> -> vector<32x1xf32>
    %256 = arith.negf %255 : vector<32x1xf32>
    %257 = math.exp %256 : vector<32x1xf32>
    %cst_84 = arith.constant 1.000000e+00 : f32
    %258 = vector.broadcast %cst_84 : f32 to vector<32x1xf32>
    %259 = arith.addf %258, %257 : vector<32x1xf32>
    %260 = arith.divf %258, %259 : vector<32x1xf32>
    %c0_85 = arith.constant 0 : index
    %c0_86 = arith.constant 0 : index
    %261 = vector.load %arg12[%c0_85, %c0_86] : memref<1x128xf32, #tpu.memory_space<vmem>>, vector<1x128xf32>
    %cst_87 = arith.constant dense<0.000000e+00> : vector<32x128xf32>
    %262 = tpu.matmul %260, %261, %cst_87 {dimension_numbers = #tpu.dot_dimension_numbers<[1], [0], [0], [1], [0, 0, 1, 1], [], []>} : vector<32x1xf32>, vector<1x128xf32>, vector<32x128xf32> -> vector<32x128xf32>
    %263 = arith.mulf %247, %262 : vector<32x128xf32>
    %c0_88 = arith.constant 0 : index
    %c0_89 = arith.constant 0 : index
    %264 = vector.load %arg7[%c0_88, %c0_89] : memref<32x16xbf16, #tpu.memory_space<vmem>>, vector<32x16xbf16>
    %265 = arith.truncf %0 : vector<16x128xf32> to vector<16x128xbf16>
    %cst_90 = arith.constant dense<0.000000e+00> : vector<32x128xf32>
    %266 = tpu.matmul %264, %265, %cst_90 {dimension_numbers = #tpu.dot_dimension_numbers<[1], [0], [0], [1], [0, 0, 1, 1], [], []>} : vector<32x16xbf16>, vector<16x128xbf16>, vector<32x128xf32> -> vector<32x128xf32>
    %267 = vector.broadcast %5 : vector<32x1xf32> to vector<32x128xf32>
    %268 = arith.addf %266, %267 : vector<32x128xf32>
    %269 = arith.addf %263, %268 : vector<32x128xf32>
    %cst_91 = arith.constant 0.000000e+00 : f32
    %270 = vector.broadcast %cst_91 : f32 to vector<32x128xf32>
    %271 = arith.maximumf %269, %270 : vector<32x128xf32>
    %c0_92 = arith.constant 0 : index
    %c0_93 = arith.constant 0 : index
    %272 = vector.load %arg13[%c0_92, %c0_93] : memref<32x128xf32, #tpu.memory_space<vmem>>, vector<32x128xf32>
    tpu.vector_store %arg13[%c0_92, %c0_93], %271 {strides = array<i32>} : memref<32x128xf32, #tpu.memory_space<vmem>>, vector<32x128xf32>,
    return
  }
  func.func @transform_0(%arg0: i32) -> (i32, i32) {
    %c0_i32 = arith.constant 0 : i32
    %c0_i32_0 = arith.constant 0 : i32
    return %c0_i32, %arg0 : i32, i32
  }
  func.func @transform_1(%arg0: i32) -> (i32, i32) {
    %c0_i32 = arith.constant 0 : i32
    %c0_i32_0 = arith.constant 0 : i32
    %c0_i32_1 = arith.constant 0 : i32
    return %c0_i32, %c0_i32_0 : i32, i32
  }
  func.func @transform_2(%arg0: i32) -> (i32, i32) {
    %c0_i32 = arith.constant 0 : i32
    %c0_i32_0 = arith.constant 0 : i32
    %c0_i32_1 = arith.constant 0 : i32
    return %c0_i32, %c0_i32_0 : i32, i32
  }
  func.func @transform_3(%arg0: i32) -> (i32, i32) {
    %c0_i32 = arith.constant 0 : i32
    %c0_i32_0 = arith.constant 0 : i32
    %c0_i32_1 = arith.constant 0 : i32
    return %c0_i32, %c0_i32_0 : i32, i32
  }
  func.func @transform_4(%arg0: i32) -> (i32, i32) {
    %c0_i32 = arith.constant 0 : i32
    %c0_i32_0 = arith.constant 0 : i32
    %c0_i32_1 = arith.constant 0 : i32
    return %c0_i32, %c0_i32_0 : i32, i32
  }
  func.func @transform_5(%arg0: i32) -> (i32, i32) {
    %c0_i32 = arith.constant 0 : i32
    %c0_i32_0 = arith.constant 0 : i32
    %c0_i32_1 = arith.constant 0 : i32
    return %c0_i32, %c0_i32_0 : i32, i32
  }
  func.func @transform_6(%arg0: i32) -> (i32, i32) {
    %c0_i32 = arith.constant 0 : i32
    %c0_i32_0 = arith.constant 0 : i32
    %c0_i32_1 = arith.constant 0 : i32
    return %c0_i32, %c0_i32_0 : i32, i32
  }
  func.func @transform_7(%arg0: i32) -> (i32, i32) {
    %c0_i32 = arith.constant 0 : i32
    %c0_i32_0 = arith.constant 0 : i32
    %c0_i32_1 = arith.constant 0 : i32
    return %c0_i32, %c0_i32_0 : i32, i32
  }
  func.func @transform_8(%arg0: i32) -> (i32, i32) {
    %c0_i32 = arith.constant 0 : i32
    %c0_i32_0 = arith.constant 0 : i32
    %c0_i32_1 = arith.constant 0 : i32
    return %c0_i32, %c0_i32_0 : i32, i32
  }
  func.func @transform_9(%arg0: i32) -> (i32, i32) {
    %c0_i32 = arith.constant 0 : i32
    %c0_i32_0 = arith.constant 0 : i32
    %c0_i32_1 = arith.constant 0 : i32
    return %c0_i32, %c0_i32_0 : i32, i32
  }
  func.func @transform_10(%arg0: i32) -> (i32, i32) {
    %c0_i32 = arith.constant 0 : i32
    %c0_i32_0 = arith.constant 0 : i32
    %c0_i32_1 = arith.constant 0 : i32
    return %c0_i32, %c0_i32_0 : i32, i32
  }
  func.func @transform_11(%arg0: i32) -> (i32, i32) {
    %c0_i32 = arith.constant 0 : i32
    %c0_i32_0 = arith.constant 0 : i32
    %c0_i32_1 = arith.constant 0 : i32
    return %c0_i32, %c0_i32_0 : i32, i32
  }
  func.func @transform_12(%arg0: i32) -> (i32, i32) {
    %c0_i32 = arith.constant 0 : i32
    %c0_i32_0 = arith.constant 0 : i32
    return %c0_i32, %arg0 : i32, i32
  }
}

</mosaic_0001>

<bundles_post_ra>
// kernel: tpu_custom_call.1
= control target key start
LH: loop header
LB: loop body
LE: loop exit
PB: predicated region body
PF: predicated region fallthrough
CT: control target
= control target key end

     0   :  { %s3220_s0 = inlined_call_operand.vmem [shape: f32[16,256], index: 0, kind: input, shape index: {}]   ;;  %s3221_s1 = inlined_call_operand.vmem [shape: f32[15,128], index: 1, kind: input, shape index: {}]   ;;  %s3222_s2 = inlined_call_operand.vmem [shape: f32[16,15], index: 2, kind: input, shape index: {}]   ;;  %s3223_s3 = inlined_call_operand.vmem [shape: f32[32,15], index: 3, kind: input, shape index: {}]   ;;  %s3224_s4 = inlined_call_operand.vmem [shape: bf16[32,16], index: 4, kind: input, shape index: {}]   ;;  %s3225_s5 = inlined_call_operand.vmem [shape: bf16[32,32], index: 5, kind: input, shape index: {}]   ;;  %s3226_s6 = inlined_call_operand.vmem [shape: bf16[32,16], index: 6, kind: input, shape index: {}]   ;;  %s3227_s7 = inlined_call_operand.vmem [shape: f32[2,32], index: 7, kind: input, shape index: {}]   ;;  %s3228_s8 = inlined_call_operand.vmem [shape: f32[32,2], index: 8, kind: input, shape index: {}]   ;;  %s3229_s9 = inlined_call_operand.vmem [shape: f32[32,3], index: 9, kind: input, shape index: {}]   ;;  %s3230_s10 = inlined_call_operand.vmem [shape: f32[128,1], index: 10, kind: input, shape index: {}]   ;;  %s3231_s11 = inlined_call_operand.vmem [shape: f32[1,128], index: 11, kind: input, shape index: {}]   ;;  %s3232_s12 = inlined_call_operand.hbm [shape: f32[32,256], index: 12, kind: output, shape index: {}]  }
   0x1   :  { %3296 = sst [smem:[#allocation12_spill]] %s3220_s0 }
   0x2   :  { %3297 = sst [smem:[#allocation13_spill]] %s3221_s1 }
   0x3   :  { %3298 = sst [smem:[#allocation14_spill]] %s3222_s2 }
   0x4   :  { %17 = vsyncpa [#allocation4], 0 }
   0x5   :  { %19 = vsyncpa [#allocation4 + $0x1], 0  ;;  %s2228_s21 = smov 0   ;;  %s2230_s22 = smov 0  }
   0x6   :  { %s2232_s23 = smov 0   ;;  %s2234_s24 = smov 0  }
   0x7 LB: > { %s3233_s25 = sadd.s32 4294967295, %s2129_s24   ;;  %s1805_s26 = sadd.s32 4294967294, %s2129_s24   ;;  %s2129_s24 = sphi %s2234_s24, %s3349_s24   ;;  %s2125_s23 = sphi %s2232_s23, %s3348_s23   ;;  %s2121_s22 = sphi %s2230_s22, %s3347_s22   ;;  %s2117_s21 = sphi %s2228_s21, %s3346_s21  }
   0x8   : > { %s2251_s27 = sadd.s32 1, %s2129_s24   ;;  %s32_s28 = sadd.s32 1, %s2125_s23 }
   0x9   : > { %s29_s29 = ssub.s32 %s2129_s24, %s2251_s27  ;;  %p39_p0 = scmp.ne.s32.totalorder %s2125_s23, %s2121_s22 }
   0xa   : > { %p30_p1 = scmp.eq.s32.totalorder %s29_s29, 0  ;;  %p40_p2 = scmp.eq.s32.totalorder %s2129_s24, 0 }
   0xb   : > { %p300_p3 = scmp.eq.s32.totalorder %s3233_s25, 1  ;;  %p305_p4 = scmp.ne.s32.totalorder %s2121_s22, %s2117_s21 }
   0xc   : > { %s2264_s30 = scalar_select %p30_p1, %s2125_s23, %s32_s28  }
   0xd   : > { %p41_p5 = por %p40_p2, %p39_p0  ;;  %p2266_p6 = por %p300_p3, %p39_p0 }
   0xe   : > { %p306_p7 = scmp.eq.s32.totalorder %s1805_s26, 1  ;;  %p1807_p9 = scmp.ge.s32.totalorder %s2129_s24, 2 }
  0x10   : > { %p2270_p8 = por %p306_p7, %p305_p4  ;;  %355 = sbr.rel (%p1807_p9) target bundleno = 33 (0x21), region = 60 }
  0x15   : > { %358 = sbr.rel (!%p41_p5) target bundleno = 33 (0x21), region = 64  ;;  %s360_s15 = sand.u32 (%p41_p5), 1, %s2125_s23  }
  0x16   : > { %s1809_s16 = sshll.u32 (%p41_p5), %s2129_s24, 3  ;;  %s1808_s17 = sshll.u32 (%p41_p5), %s360_s15, 4 }
  0x17   : > { %s3301_s0 = sld [smem:[#allocation12_spill]] (%p41_p5)  ;;  %s362_s26 = scalar_lea.vmem (%p41_p5), [#allocation2], %s1808_s17 }
  0x1d   : > { %s364_s20 = scalar_lea.vmem %s3301_s0, %s1809_s16 }
  0x1e   : > { %v395_v0 = vld [vmem:[%s364_s20] sm:$0xff]  ;;  %v397_v1 = vld [vmem:[%s364_s20 + $0x10] sm:$0xff] }
  0x1f   : > { %396 = vst [vmem:[%s362_s26] sm:$0xff] %v395_v0 }
  0x20   : > { %398 = vst [vmem:[%s362_s26 + $0x8] sm:$0xff] %v397_v1 }
  0x21 PF: > { %p1810_p10 = scmp.ge.s32.totalorder %s2129_s24, 1  ;;  %p403_p11 = scmp.lt.s32.totalorder %s2129_s24, 3 }
  0x23   : > { %p404_p12 = pnand %p1810_p10, %p403_p11 }
  0x25   : > { %407 = sbr.rel (%p404_p12) target bundleno = 1663 (0x67f), region = 102 }
  0x2a   : > { %s3302_s2 = sld [smem:[#allocation14_spill]]  ;;  %s2290_s15 = sand.u32 1, %s2121_s22   ;;  %v3282_v3 = vmov 0   ;;  %v3285_v4 = vmov 1   ;;  %v3274_v6 = vmov 6   ;;  %v3283_v9 = vmov 2  }
  0x2b   : > { %1941 = vset.pattern.permute.xlu2 %v3282_v3  ;;  %s1811_s16 = sshll.u32 %s2290_s15, 4  ;;  %1942 = vset.pattern.permute.xlu1 %v3285_v4  ;;  %s3244_s18 = smov 6   ;;  %v3280_v10 = vmov 3   ;;  %v3252_v11 = vmov 8   ;;  %v3278_v12 = vmov 4   ;;  %v3270_v13 = vmov 9  }
  0x2c   : > { %s2296_s17 = scalar_lea.vmem [#allocation2], %s1811_s16  ;;  %1950 = vset.pattern.permute.xlu0 %v3274_v6  ;;  %s3242_s19 = smov 7   ;;  %v3276_v14 = vmov 5   ;;  %v3258_v15 = vmov 11   ;;  %v3272_v16 = vmov 7   ;;  %v3250_v17 = vmov 13  }
  0x2d   : > { %v2299_v5 = vld [vmem:[%s2296_s17] sm:$0xff]  ;;  %v2312_v8 = vld [vmem:[%s2296_s17 + $0x8] sm:$0xff]  ;;  %s3292_s28 = smov 5   ;;  %s3236_s29 = smov 3   ;;  %v3264_v23 = vmov 10   ;;  %v3254_v32 = vmov 12  }
  0x2e   : > { %484 = vrot.lane.b32.xlu1 %v2299_v5, %s3244_s18  ;;  %464 = vrot.lane.b32.xlu0 %v2299_v5, %s3242_s19  ;;  %s3238_s16 = smov 1   ;;  %s3240_s20 = smov 4   ;;  %v2378_v19 = vld [vmem:[%s3229_s9 + $0x10] sm:$0xff]  ;;  %v2414_v25 = vld [vmem:[%s3223_s3 + $0x18] sm:$0xff]  ;;  %v3248_v43 = vmov 14   ;;  %vm791_vm0 = vcmask 130048  }
  0x2f   : > { %s3234_s26 = smov 2   ;;  %s3246_s25 = smov 124   ;;  %3303 = vst [vmem:[#allocation6_spill] sm:$0xff] %v2378_v19  ;;  %v2392_v21 = vld [vmem:[%s3223_s3 + $0x10] sm:$0xff]  ;;  %v2457_v38 = vld [vmem:[%s3223_s3] sm:$0xff]  ;;  %vm1381_vm1 = vcmask 261120  }
  0x30   : > { %v2287_v2 = vld [vmem:[%s3302_s2] sm:$0xff]  ;;  %v2309_v7 = vld [vmem:[%s3302_s2 + $0x8] sm:$0xff]  ;;  %3304 = vst [vmem:[#allocation7_spill] sm:$0xff] %v2392_v21  ;;  %s3308_s1 = sld [smem:[#allocation13_spill]]  ;;  %vm1494_vm2 = vcmask 1041408   ;;  %vm1481_vm3 = vcmask 15360  }
  0x31   : > { %474 = vperm.xlu2 %1941, %v2287_v2   ;;  %vm1617_vm4 = vcmask 1040384   ;;  %vm1604_vm8 = vcmask 7168   ;;  %s3345_s2 = sadd.s32 4294967295, %s2129_s24  }
  0x36   : > { %486 = vrot.lane.b32.xlu1 %v2312_v8, %s3244_s18  ;;  %466 = vrot.lane.b32.xlu0 %v2312_v8, %s3242_s19  ;;  %s3268_s18 = smov 125   ;;  %s3262_s19 = smov 123  }
  0x39   : > { %479 = vperm.xlu2 %1941, %v2309_v7  }
  0x3e   : > { %497 = vperm.xlu1 %1942, %v2309_v7   ;;  %544 = vrot.lane.b32.xlu0 %v2299_v5, %s3236_s29 }
  0x41   : > { %504 = vrot.lane.b32.xlu2 %v2299_v5, %s3292_s28 }
  0x42   : > { %1943 = vset.pattern.permute.xlu2 %v3283_v9 }
  0x46   : > { %506 = vrot.lane.b32.xlu1 %v2312_v8, %s3292_s28  ;;  %584 = vrot.lane.b32.xlu0 %v2299_v5, %s3238_s16  ;;  %s3322_s28 = smov 3  }
  0x47   : > { %1944 = vset.pattern.permute.xlu1 %v3280_v10 }
  0x49   : > { %513 = vperm.xlu2 %1943, %v2287_v2  }
  0x4e   : > { %524 = vrot.lane.b32.xlu1 %v2299_v5, %s3240_s20  ;;  %597 = vperm.xlu0 %1950, %v2309_v7  }
  0x51   : > { %526 = vrot.lane.b32.xlu2 %v2312_v8, %s3240_s20  ;;  %s3319_s20 = smov 4  }
  0x52   : > { %1945 = vset.pattern.permute.xlu2 %v3280_v10 }
  0x56   : > { %533 = vperm.xlu1 %1944, %v2287_v2   ;;  %1953 = vset.pattern.permute.xlu0 %v3252_v11 }
  0x57   : > { %625 = vperm.xlu0 %1953, %v2287_v2  }
  0x59   : > { %537 = vperm.xlu2 %1945, %v2309_v7  }
  0x5e   : > { %546 = vrot.lane.b32.xlu1 %v2312_v8, %s3236_s29  ;;  %s3266_s29 = smov 127  }
  0x5f   : > { %1956 = vset.pattern.permute.xlu0 %v3270_v13  ;;  %1947 = vset.pattern.permute.xlu1 %v3276_v14 }
  0x60   : > { %649 = vperm.xlu0 %1956, %v2309_v7  }
  0x61   : > { %1946 = vset.pattern.permute.xlu2 %v3278_v12 }
  0x62   : > { %553 = vperm.xlu2 %1946, %v2287_v2  }
  0x66   : > { %564 = vrot.lane.b32.xlu1 %v2299_v5, %s3234_s26 }
  0x68   : > { %676 = vrot.lane.b32.xlu0 %v2299_v5, %s3246_s25 }
  0x69   : > { %1960 = vset.pattern.permute.xlu0 %v3258_v15 }
  0x6a   : > { %566 = vrot.lane.b32.xlu2 %v2312_v8, %s3234_s26  ;;  %s3260_s26 = smov 122  }
  0x6b   : > { %1948 = vset.pattern.permute.xlu2 %v3276_v14 }
  0x6e   : > { %573 = vperm.xlu1 %1947, %v2287_v2  }
  0x70   : > { %689 = vperm.xlu0 %1960, %v2309_v7  }
  0x72   : > { %577 = vperm.xlu2 %1948, %v2309_v7  }
  0x76   : > { %586 = vrot.lane.b32.xlu1 %v2312_v8, %s3238_s16  ;;  %s3290_s16 = smov 126  }
  0x77   : > { %1951 = vset.pattern.permute.xlu1 %v3272_v16 }
  0x78   : > { %716 = vrot.lane.b32.xlu0 %v2299_v5, %s3260_s26 }
  0x79   : > { %1964 = vset.pattern.permute.xlu0 %v3250_v17 }
  0x7a   : > { %1949 = vset.pattern.permute.xlu2 %v3274_v6 }
  0x7b   : > { %593 = vperm.xlu2 %1949, %v2287_v2  }
  0x7e   : > { %605 = vperm.xlu1 %1951, %v2287_v2  }
  0x80   : > { %729 = vperm.xlu0 %1964, %v2309_v7  }
  0x83   : > { %1952 = vset.pattern.permute.xlu2 %v3272_v16 }
  0x84   : > { %609 = vperm.xlu2 %1952, %v2309_v7  }
  0x86   : > { %616 = vrot.lane.b32.xlu1 %v2299_v5, %s3266_s29 }
  0x87   : > { %1954 = vset.pattern.permute.xlu1 %v3252_v11 }
  0x88   : > { %1967 = vset.pattern.permute.xlu0 %v3282_v3 }
  0x89   : > { %773 = vperm.xlu0 %1967, %v2378_v19  }
  0x8b   : > { %v2373_v18 = vpop.permute.xlu2 %474 }
  0x8c   : > { %618 = vrot.lane.b32.xlu2 %v2312_v8, %s3266_s29  ;;  %s3326_s29 = smov 1  }
  0x8d   : > { %1955 = vset.pattern.permute.xlu2 %v3270_v13  ;;  %v2536_v13 = vld [vmem:[%s3308_s1 + $0x1] ss:$0 sm:$0xff] }
  0x8e   : > { %629 = vperm.xlu1 %1954, %v2309_v7  }
  0x91   : > { %845 = vperm.xlu0 %1967, %v2392_v21  }
  0x93   : > { %v2387_v20 = vpop.permute.xlu2 %479 }
  0x94   : > { %636 = vrot.lane.b32.xlu2 %v2299_v5, %s3290_s16 }
  0x96   : > { %638 = vrot.lane.b32.xlu1 %v2312_v8, %s3290_s16  ;;  %s3323_s16 = smov 2  }
  0x97   : > { %1957 = vset.pattern.permute.xlu1 %v3264_v23 }
  0x99   : > { %1970 = vset.pattern.permute.xlu0 %v3283_v9 }
  0x9a   : > { %517 = vperm.xlu0 %1970, %v2309_v7  }
  0x9b   : > { %v2399_v22 = vpop.permute.xlu2 %504 }
  0x9c   : > { %645 = vperm.xlu2 %1955, %v2287_v2  }
  0x9e   : > { %656 = vrot.lane.b32.xlu1 %v2299_v5, %s3268_s18 }
  0xa0   : > { %v2416_v26 = vpop.permute.xlu1 %484  ;;  %v2418_v27 = vpop.permute.xlu0 %464 }
  0xa2   : > { %918 = vperm.xlu0 %1970, %v2414_v25  }
  0xa3   : > { %v2407_v24 = vpop.permute.xlu2 %513 }
  0xa4   : > { %658 = vrot.lane.b32.xlu2 %v2312_v8, %s3268_s18  ;;  %s3316_s18 = smov 5  }
  0xa5   : > { %1958 = vset.pattern.permute.xlu2 %v3264_v23  ;;  %v2531_v23 = vld [vmem:[%s3308_s1 + $0x2] ss:$0 sm:$0xff] }
  0xa6   : > { %665 = vperm.xlu1 %1957, %v2287_v2   ;;  %v510_v14 = vmul.f32 %v2531_v23, %v2399_v22 }
  0xa8   : > { %v2426_v29 = vpop.permute.xlu1 %486  ;;  %v2428_v30 = vpop.permute.xlu0 %466 }
  0xaa   : > { %1973 = vset.pattern.permute.xlu0 %v3285_v4  ;;  %v2553_v4 = vld [vmem:[%s3308_s1 + $0x4] ss:$0 sm:$0xff] }
  0xab   : > { %v2423_v28 = vpop.permute.xlu2 %526  ;;  %493 = vperm.xlu0 %1973, %v2287_v2  }
  0xac   : > { %669 = vperm.xlu2 %1958, %v2309_v7  }
  0xae   : > { %678 = vrot.lane.b32.xlu1 %v2312_v8, %s3246_s25  ;;  %s3256_s25 = smov 121  }
  0xaf   : > { %1961 = vset.pattern.permute.xlu1 %v3254_v32 }
  0xb0   : > { %v2439_v33 = vpop.permute.xlu1 %497  ;;  %v2441_v34 = vpop.permute.xlu0 %544 }
  0xb3   : > { %v2434_v31 = vpop.permute.xlu2 %537  ;;  %882 = vperm.xlu0 %1973, %v2414_v25  }
  0xb4   : > { %1959 = vset.pattern.permute.xlu2 %v3258_v15  ;;  %v2526_v15 = vld [vmem:[%s3308_s1] ss:$0 sm:$0xff] }
  0xb5   : > { %685 = vperm.xlu2 %1959, %v2287_v2   ;;  %v470_v6 = vmul.f32 %v2526_v15, %v2418_v27 }
  0xb6   : > { %696 = vrot.lane.b32.xlu1 %v2299_v5, %s3262_s19 }
  0xb7   : > { %v482_v9 = vmul.f32 %v2373_v18, %v470_v6  ;;  %v550_v6 = vmul.f32 %v2553_v4, %v2441_v34  ;;  %v2571_v18 = vld [vmem:[%s3308_s1 + $0x6] ss:$0 sm:$0xff] }
  0xb8   : > { %v2450_v36 = vpop.permute.xlu1 %506  ;;  %v2452_v37 = vpop.permute.xlu0 %584 }
  0xb9   : > { %v590_v34 = vmul.f32 %v2571_v18, %v2452_v37  ;;  %v2597_v37 = vld [vmem:[%s3308_s1 + $0xa] ss:$0 sm:$0xff] }
  0xbb   : > { %870 = vperm.xlu0 %1973, %v2457_v38  }
  0xbc   : > { %v2446_v35 = vpop.permute.xlu2 %553 }
  0xbd   : > { %698 = vrot.lane.b32.xlu2 %v2312_v8, %s3262_s19  ;;  %s3317_s19 = smov 6  }
  0xbe   : > { %1962 = vset.pattern.permute.xlu2 %v3254_v32  ;;  %705 = vperm.xlu1 %1961, %v2287_v2  }
  0xc0   : > { %v525_v40 = vpop.permute.xlu1 %524  ;;  %v2465_v41 = vpop.permute.xlu0 %597 }
  0xc3   : > { %1977 = vset.pattern.permute.xlu0 %v3280_v10  ;;  %v2547_v10 = vld [vmem:[%s3308_s1 + $0x3] ss:$0 sm:$0xff] }
  0xc4   : > { %v2462_v39 = vpop.permute.xlu2 %566  ;;  %954 = vperm.xlu0 %1977, %v2414_v25   ;;  %v530_v27 = vmul.f32 %v2547_v10, %v525_v40 }
  0xc5   : > { %709 = vperm.xlu2 %1962, %v2309_v7  }
  0xc6   : > { %718 = vrot.lane.b32.xlu1 %v2312_v8, %s3260_s26  ;;  %s3328_s26 = smov 126  }
  0xc7   : > { %1965 = vset.pattern.permute.xlu1 %v3248_v43 }
  0xc8   : > { %v534_v44 = vpop.permute.xlu1 %533 }
  0xc9   : > { %v2476_v45 = vpop.permute.xlu0 %625 }
  0xcc   : > { %v2471_v42 = vpop.permute.xlu2 %577  ;;  %1978 = vset.pattern.permute.xlu0 %v3278_v12  ;;  %v490_v12 = vmul.f32 %v2536_v13, %v2416_v26  ;;  %v520_v26 = vmul.f32 %v2407_v24, %v510_v14  ;;  %v560_v24 = vmul.f32 %v2446_v35, %v550_v6 }
  0xcd   : > { %1963 = vset.pattern.permute.xlu2 %v3250_v17  ;;  %557 = vperm.xlu0 %1978, %v2309_v7  }
  0xce   : > { %725 = vperm.xlu2 %1963, %v2287_v2   ;;  %736 = vrot.lane.b32.xlu1 %v2299_v5, %s3256_s25 }
  0xd0   : > { %v2482_v46 = vpop.permute.xlu1 %546 }
  0xd2   : > { %v2486_v48 = vpop.permute.xlu0 %649 }
  0xd5   : > { %v594_v47 = vpop.permute.xlu2 %593 }
  0xd6   : > { %738 = vrot.lane.b32.xlu2 %v2312_v8, %s3256_s25  ;;  %745 = vperm.xlu1 %1965, %v2287_v2   ;;  %s3318_s25 = smov 7  }
  0xd7   : > { %1966 = vset.pattern.permute.xlu2 %v3248_v43 }
  0xd8   : > { %v565_v49 = vpop.permute.xlu1 %564 }
  0xda   : > { %v2493_v51 = vpop.permute.xlu0 %676 }
  0xde   : > { %v2490_v50 = vpop.permute.xlu2 %609  ;;  %749 = vperm.xlu2 %1966, %v2309_v7   ;;  %1968 = vset.pattern.permute.xlu1 %v3282_v3 }
  0xe0   : > { %v574_v52 = vpop.permute.xlu1 %573 }
  0xe2   : > { %v2497_v53 = vpop.permute.xlu0 %689 }
  0xe6   : > { %1969 = vset.pattern.permute.xlu2 %v3282_v3  ;;  %v2499_v54 = vpop.permute.xlu2 %618 }
  0xe8   : > { %v2501_v55 = vpop.permute.xlu1 %586 }
  0xea   : > { %v2503_v56 = vpop.permute.xlu0 %716 }
  0xee   : > { %v637_v57 = vpop.permute.xlu2 %636 }
  0xf0   : > { %v606_v58 = vpop.permute.xlu1 %605 }
  0xf2   : > { %v2505_v59 = vpop.permute.xlu0 %729 }
  0xf6   : > { %v646_v60 = vpop.permute.xlu2 %645 }
  0xf8   : > { %v617_v61 = vpop.permute.xlu1 %616 }
  0xfb   : > { %v2507_v62 = vpop.permute.xlu0 %773 }
  0xfc   : > { %3305 = vst [vmem:[#allocation8_spill] sm:$0xff] %v2507_v62 }
  0xfe   : > { %v2511_v0 = vpop.permute.xlu2 %658 }
 0x100   : > { %v2509_v63 = vpop.permute.xlu1 %629 }
 0x103   : > { %v2513_v1 = vpop.permute.xlu0 %845 }
 0x104   : > { %3306 = vst [vmem:[#allocation9_spill] sm:$0xff] %v2513_v1  ;;  %v2562_v1 = vld [vmem:[%s3308_s1 + $0x5] ss:$0 sm:$0xff] }
 0x106   : > { %v2517_v7 = vpop.permute.xlu2 %669 }
 0x108   : > { %v2515_v2 = vpop.permute.xlu1 %638 }
 0x10c   : > { %v2519_v43 = vpop.permute.xlu0 %517 }
 0x10f   : > { %v686_v32 = vpop.permute.xlu2 %685 }
 0x110   : > { %v657_v17 = vpop.permute.xlu1 %656 }
 0x114   : > { %v2521_v11 = vpop.permute.xlu0 %918 }
 0x115   : > { %3307 = vst [vmem:[#allocation10_spill] sm:$0xff] %v2521_v11 }
 0x117   : > { %v2556_v22 = vpop.permute.xlu2 %698 }
 0x118   : > { %v666_v16 = vpop.permute.xlu1 %665 }
 0x11d   : > { %v494_v3 = vpop.permute.xlu0 %493 }
 0x11e   : > { %v500_v19 = vmul.f32 %v494_v3, %v490_v12  ;;  %v540_v3 = vmul.f32 %v534_v44, %v530_v27  ;;  %v570_v12 = vmul.f32 %v2562_v1, %v565_v49  ;;  %v2587_v44 = vld [vmem:[%s3308_s1 + $0x9] ss:$0 sm:$0xff]  ;;  %v600_v49 = vmul.f32 %v594_v47, %v590_v34 }
 0x11f   : > { %v2590_v6 = vpop.permute.xlu2 %709 }
 0x120   : > { %v502_v11 = vadd.f32 %v500_v19, %v482_v9  ;;  %v2564_v62 = vpop.permute.xlu1 %678  ;;  %v2578_v9 = vld [vmem:[%s3308_s1 + $0x8] ss:$0 sm:$0xff]  ;;  %v580_v21 = vmul.f32 %v574_v52, %v570_v12  ;;  %v2602_v52 = vld [vmem:[%s3308_s1 + $0xc] ss:$0 sm:$0xff] }
 0x121   : > { %v622_v35 = vmul.f32 %v2578_v9, %v617_v61 }
 0x122   : > { %v522_v14 = vadd.f32 %v520_v26, %v502_v11 }
 0x124   : > { %v542_v19 = vadd.f32 %v540_v3, %v522_v14  ;;  %v642_v3 = vmul.f32 %v2587_v44, %v637_v57  ;;  %v612_v14 = vmul.f32 %v606_v58, %v2299_v5  ;;  %v2613_v5 = vld [vmem:[%s3308_s1 + $0xb] ss:$0 sm:$0xff]  ;;  %v632_v57 = vmul.f32 %v2476_v45, %v622_v35 }
 0x125   : > { %v2580_v40 = vpop.permute.xlu0 %882  ;;  %v662_v58 = vmul.f32 %v2597_v37, %v657_v17  ;;  %v491_v17 = vmul.f32 %v2536_v13, %v2426_v29 }
 0x126   : > { %v562_v11 = vadd.f32 %v560_v24, %v542_v19  ;;  %v652_v24 = vmul.f32 %v646_v60, %v642_v3 }
 0x128   : > { %v582_v27 = vadd.f32 %v580_v21, %v562_v11  ;;  %v697_v26 = vpop.permute.xlu1 %696  ;;  %v2607_v21 = vld [vmem:[%s3229_s9 + $0x18] sm:$0xff]  ;;  %v682_v11 = vmul.f32 %v2613_v5, %v2493_v51  ;;  %v726_v3 = vpop.permute.xlu2 %725 }
 0x129   : > { %3309 = vst [vmem:[#allocation11_spill] sm:$0xff] %v2607_v21  ;;  %778 = vperm.xlu1 %1968, %v2607_v21   ;;  %v702_v19 = vmul.f32 %v2602_v52, %v697_v26  ;;  %v471_v26 = vmul.f32 %v2526_v15, %v2428_v30  ;;  %v531_v30 = vmul.f32 %v2547_v10, %v2423_v28 }
 0x12a   : > { %v602_v47 = vadd.f32 %v600_v49, %v582_v27  ;;  %v2625_v49 = vld [vmem:[%s3308_s1 + $0xd] ss:$0 sm:$0xff]  ;;  %v672_v27 = vmul.f32 %v666_v16, %v662_v58  ;;  %v692_v35 = vmul.f32 %v686_v32, %v682_v11  ;;  %v511_v16 = vmul.f32 %v2531_v23, %v2450_v36 }
 0x12b   : > { %v722_v51 = vmul.f32 %v2625_v49, %v2503_v56  ;;  %v483_v29 = vmul.f32 %v2387_v20, %v471_v26  ;;  %v541_v36 = vmul.f32 %v2434_v31, %v531_v30  ;;  %v571_v11 = vmul.f32 %v2562_v1, %v2462_v39 }
 0x12c   : > { %v614_v61 = vadd.f32 %v612_v14, %v602_v47  ;;  %v521_v32 = vmul.f32 %v2519_v43, %v511_v16  ;;  %v551_v20 = vmul.f32 %v2553_v4, %v2482_v46  ;;  %v591_v28 = vmul.f32 %v2571_v18, %v2501_v55 }
 0x12d   : > { %v2617_v12 = vpop.permute.xlu0 %870  ;;  %v732_v58 = vmul.f32 %v726_v3, %v722_v51  ;;  %v623_v31 = vmul.f32 %v2578_v9, %v2499_v54  ;;  %v613_v46 = vmul.f32 %v2490_v50, %v2312_v8  ;;  %v643_v3 = vmul.f32 %v2587_v44, %v2515_v2  ;;  %v2673_v8 = vld [vmem:[%s3308_s1 + $0xe] ss:$0 sm:$0xff] }
 0x12e   : > { %v634_v34 = vadd.f32 %v632_v57, %v614_v61  ;;  %v501_v57 = vmul.f32 %v2439_v33, %v491_v17  ;;  %v2645_v33 = vld [vmem:[%s3229_s9 + $0x8] sm:$0xff]  ;;  %v581_v17 = vmul.f32 %v2471_v42, %v571_v11  ;;  %v663_v42 = vmul.f32 %v2597_v37, %v2511_v0 }
 0x12f   : > { %v633_v51 = vmul.f32 %v2509_v63, %v623_v31  ;;  %v703_v2 = vmul.f32 %v2602_v52, %v2556_v22  ;;  %v3310_v11 = vmov 1  }
 0x130   : > { %v654_v21 = vadd.f32 %v652_v24, %v634_v34  ;;  %v706_v45 = vpop.permute.xlu1 %705  ;;  %v739_v55 = vpop.permute.xlu2 %738  ;;  %v673_v50 = vmul.f32 %v2517_v7, %v663_v42 }
 0x131   : > { %v712_v60 = vmul.f32 %v706_v45, %v702_v19  ;;  %v503_v19 = vadd.f32 %v501_v57, %v483_v29  ;;  %768 = vperm.xlu1 %1968, %v2645_v33   ;;  %v713_v22 = vmul.f32 %v2590_v6, %v703_v2  ;;  %v743_v52 = vmul.f32 %v2673_v8, %v739_v55  ;;  %v3311_v6 = vld [vmem:[#allocation7_spill] sm:$0xff] }
 0x132   : > { %v674_v14 = vadd.f32 %v672_v27, %v654_v21 }
 0x133   : > { %v523_v34 = vadd.f32 %v521_v32, %v503_v19 }
 0x134   : > { %v694_v47 = vadd.f32 %v692_v35, %v674_v14  ;;  %v601_v14 = vmul.f32 %v2465_v41, %v591_v28  ;;  %v683_v41 = vmul.f32 %v2613_v5, %v2564_v62  ;;  %v2682_v62 = vld [vmem:[%s3229_s9] sm:$0xff]  ;;  %v3313_v28 = vmov 0  }
 0x135   : > { %v543_v27 = vadd.f32 %v541_v36, %v523_v34  ;;  %763 = vperm.xlu2 %1969, %v2682_v62  }
 0x136   : > { %v714_v61 = vadd.f32 %v712_v60, %v694_v47  ;;  %v2636_v24 = vpop.permute.xlu0 %954  ;;  %v653_v47 = vmul.f32 %v2486_v48, %v643_v3  ;;  %v693_v63 = vmul.f32 %v2497_v53, %v683_v41 }
 0x138   : > { %v734_v21 = vadd.f32 %v732_v58, %v714_v61  ;;  %v719_v56 = vpop.permute.xlu1 %718  ;;  %v750_v61 = vpop.permute.xlu2 %749 }
 0x139   : > { %850 = vperm.xlu1 %1968, %v2414_v25   ;;  %v723_v48 = vmul.f32 %v2625_v49, %v719_v56  ;;  %v753_v19 = vmul.f32 %v750_v61, %v743_v52 }
 0x13b   : > { %v733_v29 = vmul.f32 %v2505_v59, %v723_v48  ;;  %v3324_v48 = vmov 6  }
 0x13d   : > { %1971 = vset.pattern.permute.xlu2 %v3310_v11 }
 0x13e   : > { %878 = vperm.xlu2 %1971, %v3311_v6  }
 0x13f   : > { %v558_v43 = vpop.permute.xlu0 %557 }
 0x140   : > { %v561_v45 = vmul.f32 %v558_v43, %v551_v20  ;;  %v737_v60 = vpop.permute.xlu1 %736  ;;  %v2695_v20 = vld [vmem:[%s3223_s3 + $0x8] sm:$0xff]  ;;  %v1862_v43 = vld [vmem:[%s3224_s4] sm:$0xff] }
 0x141   : > { %v742_v16 = vmul.f32 %v2673_v8, %v737_v60  ;;  %835 = vperm.xlu1 %1968, %v2457_v38  }
 0x142   : > { %v563_v35 = vadd.f32 %v561_v45, %v543_v27  ;;  %v3314_v27 = vmov 3   ;;  %v1863_v45 = vld [vmem:[%s3224_s4 + $0x8] sm:$0xff] }
 0x144   : > { %v583_v39 = vadd.f32 %v581_v17, %v563_v35  ;;  %v3315_v17 = vmov 4  }
 0x146   : > { %v603_v26 = vadd.f32 %v601_v14, %v583_v39 }
 0x148   : > { %v615_v54 = vadd.f32 %v613_v46, %v603_v26  ;;  %v746_v7 = vpop.permute.xlu1 %745 }
 0x149   : > { %v752_v32 = vmul.f32 %v746_v7, %v742_v16  ;;  %1975 = vset.pattern.permute.xlu1 %v3310_v11 }
 0x14a   : > { %v635_v57 = vadd.f32 %v633_v51, %v615_v54  ;;  %874 = vperm.xlu1 %1975, %v2695_v20   ;;  %v3320_v51 = vmov 5   ;;  %v3321_v54 = vld [vmem:[#allocation8_spill] sm:$0xff] }
 0x14b   : > { %v754_v34 = vadd.f32 %v752_v32, %v734_v21  ;;  %v3312_v21 = vmov 2   ;;  %v3327_v32 = vmov 9  }
 0x14c   : > { %v655_v0 = vadd.f32 %v653_v47, %v635_v57  ;;  %1972 = vset.pattern.permute.xlu2 %v3312_v21 }
 0x14d   : > { %914 = vperm.xlu2 %1972, %v3311_v6  }
 0x14e   : > { %v675_v58 = vadd.f32 %v673_v50, %v655_v0 }
 0x150   : > { %v695_v53 = vadd.f32 %v693_v63, %v675_v58 }
 0x152   : > { %v715_v30 = vadd.f32 %v713_v22, %v695_v53  ;;  %1979 = vset.pattern.permute.xlu1 %v3312_v21  ;;  %v3325_v53 = vmov 7  }
 0x153   : > { %906 = vperm.xlu1 %1979, %v2457_v38  }
 0x154   : > { %v735_v56 = vadd.f32 %v733_v29, %v715_v30 }
 0x155   : > { %1974 = vset.pattern.permute.xlu2 %v3313_v28 }
 0x156   : > { %v755_v36 = vadd.f32 %v753_v19, %v735_v56  ;;  %840 = vperm.xlu2 %1974, %v2695_v20  }
 0x158   : > { %v760_v59 = vpack.c.bf16 %v755_v36, %v754_v34 }
 0x15a   : > { %805 = vmatpush.bf16.msra.mxu0 %v760_v59  ;;  %v3329_v59 = vmov 10  }
 0x15b   : > { %1982 = vset.pattern.permute.xlu1 %v3314_v27 }
 0x15d   : > { %1821 = vmatmul.msk.bf16.vlgmr.msra.gmra.mxu0 %vm791_vm0, %v1862_v43 }
 0x15e   : > { %1976 = vset.pattern.permute.xlu2 %v3314_v27 }
 0x15f   : > { %950 = vperm.xlu2 %1976, %v3311_v6  }
 0x167   : > { %1980 = vset.pattern.permute.xlu2 %v3312_v21 }
 0x168   : > { %910 = vperm.xlu2 %1980, %v2695_v20  }
 0x16d   : > { %1822 = vmatmul.msk.bf16.gmra.mxu0 %vm791_vm0, %v1863_v45 }
 0x170   : > { %1981 = vset.pattern.permute.xlu2 %v3315_v17 }
 0x171   : > { %986 = vperm.xlu2 %1981, %v3311_v6  }
 0x179   : > { %1983 = vset.pattern.permute.xlu2 %v3314_v27 }
 0x18f   : > { %v764_v35 = vpop.permute.xlu2 %763 }
 0x198   : > { %v2755_v0 = vpop.permute.xlu2 %878 }
 0x19b   : > { %v779_v60 = vpop.permute.xlu1 %778 }
 0x1a3   : > { %v769_v3 = vpop.permute.xlu1 %768 }
 0x1a7   : > { %v2765_v63 = vpop.permute.xlu2 %914 }
 0x1ab   : > { %v2786_v7 = vpop.permute.xlu1 %850 }
 0x1b0   : > { %v2777_v16 = vpop.permute.xlu2 %840 }
 0x1b3   : > { %v836_v52 = vpop.permute.xlu1 %835 }
 0x1b9   : > { %v2784_v58 = vpop.permute.xlu2 %950 }
 0x1bc   : > { %v875_v29 = vpop.permute.xlu1 %874 }
 0x1c2   : > { %v2793_v22 = vpop.permute.xlu2 %910 }
 0x1c5   : > { %v907_v19 = vpop.permute.xlu1 %906 }
 0x1cb   : > { %v2803_v61 = vpop.permute.xlu2 %986 }
 0x1da   : > { %v807_v31 = vpop.f32.mrf.mxu0 }
 0x1db   : > { %v808_v14 = vadd.f32 %v807_v31, %v764_v35  ;;  %v3331_v35 = vmov 11  }
 0x1dd   : > { %v2722_v39 = vmax.f32 %v808_v14, 0.0 }
 0x1df   : > { %893 = vrot.lane.b32.xlu2 %v2722_v39, %s3316_s18  ;;  %857 = vrot.lane.b32.xlu0 %v2722_v39, %s3317_s19 }
 0x1e0   : > { %821 = vrot.lane.b32.xlu1 %v2722_v39, %s3318_s25 }
 0x1e2   : > { %v809_v46 = vpop.f32.mrf.mxu0 }
 0x1e3   : > { %v810_v26 = vadd.f32 %v809_v46, %v769_v3 }
 0x1e5   : > { %v2734_v42 = vmax.f32 %v810_v26, 0.0 }
 0x1e7   : > { %946 = vperm.xlu2 %1983, %v2695_v20   ;;  %929 = vrot.lane.b32.xlu0 %v2722_v39, %s3319_s20 }
 0x1e8   : > { %942 = vperm.xlu1 %1982, %v2457_v38  }
 0x1ea   : > { %v812_v55 = vpop.f32.mrf.mxu0 }
 0x1eb   : > { %v813_v41 = vadd.f32 %v812_v55, %v3321_v54 }
 0x1ed   : > { %v2744_v47 = vmax.f32 %v813_v41, 0.0 }
 0x1ef   : > { %823 = vrot.lane.b32.xlu2 %v2734_v42, %s3318_s25  ;;  %990 = vperm.xlu0 %1978, %v2414_v25  }
 0x1f0   : > { %859 = vrot.lane.b32.xlu1 %v2734_v42, %s3317_s19  ;;  %1984 = vset.pattern.permute.xlu2 %v3320_v51 }
 0x1f1   : > { %1986 = vset.pattern.permute.xlu1 %v3315_v17 }
 0x1f2   : > { %v814_v57 = vpop.f32.mrf.mxu0 }
 0x1f3   : > { %v815_v50 = vadd.f32 %v814_v57, %v779_v60 }
 0x1f5   : > { %v2753_v2 = vmax.f32 %v815_v50, 0.0 }
 0x1f7   : > { %825 = vrot.lane.b32.xlu2 %v2744_v47, %s3318_s25  ;;  %965 = vrot.lane.b32.xlu0 %v2722_v39, %s3322_s28 }
 0x1f8   : > { %895 = vrot.lane.b32.xlu1 %v2734_v42, %s3316_s18  ;;  %1985 = vset.pattern.permute.xlu0 %v3320_v51 }
 0x1ff   : > { %1022 = vperm.xlu2 %1984, %v3311_v6   ;;  %827 = vrot.lane.b32.xlu0 %v2753_v2, %s3318_s25  ;;  %s3333_s25 = smov 124  }
 0x200   : > { %931 = vrot.lane.b32.xlu1 %v2734_v42, %s3319_s20 }
 0x207   : > { %863 = vrot.lane.b32.xlu2 %v2753_v2, %s3317_s19  ;;  %1026 = vperm.xlu0 %1985, %v2414_v25  }
 0x208   : > { %861 = vrot.lane.b32.xlu1 %v2744_v47, %s3317_s19  ;;  %1987 = vset.pattern.permute.xlu2 %v3315_v17  ;;  %s3332_s19 = smov 127  }
 0x20f   : > { %899 = vrot.lane.b32.xlu2 %v2753_v2, %s3316_s18  ;;  %1001 = vrot.lane.b32.xlu0 %v2722_v39, %s3323_s16 }
 0x210   : > { %897 = vrot.lane.b32.xlu1 %v2744_v47, %s3316_s18  ;;  %1989 = vset.pattern.permute.xlu0 %v3324_v48  ;;  %s3330_s18 = smov 125  }
 0x217   : > { %935 = vrot.lane.b32.xlu2 %v2753_v2, %s3319_s20  ;;  %1062 = vperm.xlu0 %1989, %v2414_v25  }
 0x218   : > { %933 = vrot.lane.b32.xlu1 %v2744_v47, %s3319_s20  ;;  %s3336_s20 = smov 123  }
 0x21f   : > { %971 = vrot.lane.b32.xlu2 %v2753_v2, %s3322_s28  ;;  %1054 = vperm.xlu0 %1989, %v2695_v20  }
 0x220   : > { %969 = vrot.lane.b32.xlu1 %v2744_v47, %s3322_s28 }
 0x227   : > { %1007 = vrot.lane.b32.xlu2 %v2753_v2, %s3323_s16  ;;  %1994 = vset.pattern.permute.xlu0 %v3325_v53 }
 0x228   : > { %1005 = vrot.lane.b32.xlu1 %v2744_v47, %s3323_s16  ;;  %1082 = vperm.xlu0 %1994, %v3311_v6  }
 0x22f   : > { %1043 = vrot.lane.b32.xlu2 %v2753_v2, %s3326_s29 }
 0x230   : > { %967 = vrot.lane.b32.xlu1 %v2734_v42, %s3322_s28  ;;  %1074 = vperm.xlu0 %1994, %v2457_v38   ;;  %s3340_s28 = smov 122  }
 0x237   : > { %982 = vperm.xlu2 %1987, %v2695_v20  }
 0x238   : > { %1041 = vrot.lane.b32.xlu1 %v2744_v47, %s3326_s29  ;;  %1999 = vset.pattern.permute.xlu0 %v3327_v32 }
 0x239   : > { %v894_v30 = vpop.permute.xlu2 %893  ;;  %1158 = vperm.xlu0 %1999, %v2414_v25  }
 0x23a   : > { %v901_v56 = vmul.f32 %v2531_v23, %v894_v30  ;;  %v3334_v30 = vmov 12  }
 0x23c   : > { %v921_v34 = vmul.f32 %v907_v19, %v901_v56 }
 0x23f   : > { %1988 = vset.pattern.permute.xlu2 %v3324_v48 }
 0x240   : > { %978 = vperm.xlu1 %1986, %v2457_v38   ;;  %1058 = vperm.xlu2 %1988, %v3311_v6  }
 0x241   : > { %v2817_v36 = vpop.permute.xlu2 %946  ;;  %1133 = vrot.lane.b32.xlu0 %v2722_v39, %s3328_s26 }
 0x242   : > { %2003 = vset.pattern.permute.xlu0 %v3329_v59 }
 0x248   : > { %1003 = vrot.lane.b32.xlu1 %v2734_v42, %s3323_s16  ;;  %1991 = vset.pattern.permute.xlu2 %v3320_v51  ;;  %s2087_s16 = scalar_lea.hbm %s3232_s12, 64 }
 0x249   : > { %1018 = vperm.xlu2 %1991, %v2695_v20   ;;  %v824_v43 = vpop.permute.xlu2 %823  ;;  %1194 = vperm.xlu0 %2003, %v2414_v25  }
 0x24a   : > { %1990 = vset.pattern.permute.xlu1 %v3320_v51  ;;  %v830_v57 = vmul.f32 %v2526_v15, %v824_v43  ;;  %v3335_v43 = vmov 8  }
 0x24c   : > { %v854_v56 = vmul.f32 %v2777_v16, %v830_v57 }
 0x250   : > { %1014 = vperm.xlu1 %1990, %v2457_v38  }
 0x251   : > { %1039 = vrot.lane.b32.xlu2 %v2734_v42, %s3326_s29  ;;  %v2831_v28 = vpop.permute.xlu2 %825  ;;  %1169 = vrot.lane.b32.xlu0 %v2722_v39, %s3330_s18  ;;  %v858_v27 = vpop.permute.xlu0 %857 }
 0x252   : > { %v865_v45 = vmul.f32 %v2536_v13, %v858_v27  ;;  %v822_v17 = vpop.permute.xlu1 %821  ;;  %2007 = vset.pattern.permute.xlu0 %v3331_v35  ;;  %1993 = vset.pattern.permute.xlu2 %v3324_v48 }
 0x253   : > { %v829_v31 = vmul.f32 %v2526_v15, %v822_v17 }
 0x254   : > { %v885_v14 = vmul.f32 %v2617_v12, %v865_v45 }
 0x255   : > { %v853_v60 = vmul.f32 %v836_v52, %v829_v31 }
 0x257   : > { %v889_v46 = vadd.f32 %v885_v14, %v853_v60 }
 0x258   : > { %1037 = vrot.lane.b32.xlu1 %v2722_v39, %s3326_s29 }
 0x259   : > { %1101 = vrot.lane.b32.xlu2 %v2744_v47, %s3332_s19  ;;  %v2844_v3 = vpop.permute.xlu2 %1022  ;;  %1230 = vperm.xlu0 %2007, %v2414_v25   ;;  %v930_v26 = vpop.permute.xlu0 %929  ;;  %v925_v55 = vadd.f32 %v921_v34, %v889_v46 }
 0x25a   : > { %v937_v51 = vmul.f32 %v2547_v10, %v930_v26  ;;  %v943_v54 = vpop.permute.xlu1 %942  ;;  %1992 = vset.pattern.permute.xlu1 %v3325_v53 }
 0x25c   : > { %v957_v12 = vmul.f32 %v943_v54, %v937_v51 }
 0x25e   : > { %v2849_v41 = vadd.f32 %v957_v12, %v925_v55  ;;  %v3337_v12 = vmov 13  }
 0x260   : > { %1086 = vperm.xlu1 %1992, %v2414_v25  }
 0x261   : > { %1050 = vperm.xlu2 %1993, %v2457_v38   ;;  %v864_v50 = vpop.permute.xlu2 %863  ;;  %1205 = vrot.lane.b32.xlu0 %v2722_v39, %s3333_s25  ;;  %v991_v48 = vpop.permute.xlu0 %990 }
 0x262   : > { %v860_v52 = vpop.permute.xlu1 %859  ;;  %2011 = vset.pattern.permute.xlu0 %v3334_v30  ;;  %v868_v60 = vmul.f32 %v2536_v13, %v864_v50 }
 0x263   : > { %v866_v19 = vmul.f32 %v2536_v13, %v860_v52 }
 0x264   : > { %v888_v57 = vmul.f32 %v2580_v40, %v868_v60  ;;  %v831_v40 = vmul.f32 %v2526_v15, %v2831_v28 }
 0x265   : > { %v886_v34 = vmul.f32 %v875_v29, %v866_v19 }
 0x267   : > { %v890_v27 = vadd.f32 %v886_v34, %v854_v56  ;;  %v3338_v56 = vld [vmem:[#allocation10_spill] sm:$0xff] }
 0x268   : > { %1103 = vrot.lane.b32.xlu1 %v2753_v2, %s3332_s19 }
 0x269   : > { %1996 = vset.pattern.permute.xlu2 %v3335_v43  ;;  %v900_v45 = vpop.permute.xlu2 %899  ;;  %1266 = vperm.xlu0 %2011, %v2414_v25   ;;  %v2863_v17 = vpop.permute.xlu0 %965 }
 0x26a   : > { %v896_v31 = vpop.permute.xlu1 %895  ;;  %1122 = vperm.xlu2 %1996, %v2414_v25   ;;  %1995 = vset.pattern.permute.xlu1 %v3335_v43  ;;  %v904_v55 = vmul.f32 %v2531_v23, %v900_v45 }
 0x26b   : > { %v902_v14 = vmul.f32 %v2531_v23, %v896_v31 }
 0x26c   : > { %v924_v34 = vmul.f32 %v3338_v56, %v904_v55 }
 0x26d   : > { %v922_v16 = vmul.f32 %v2793_v22, %v902_v14 }
 0x26f   : > { %v926_v29 = vadd.f32 %v922_v16, %v890_v27 }
 0x270   : > { %1118 = vperm.xlu1 %1995, %v3311_v6  }
 0x271   : > { %v936_v46 = vpop.permute.xlu2 %935  ;;  %1241 = vrot.lane.b32.xlu0 %v2722_v39, %s3336_s20  ;;  %v828_v26 = vpop.permute.xlu0 %827 }
 0x272   : > { %v832_v51 = vmul.f32 %v2526_v15, %v828_v26  ;;  %v932_v54 = vpop.permute.xlu1 %931  ;;  %1139 = vrot.lane.b32.xlu2 %v2753_v2, %s3328_s26  ;;  %2015 = vset.pattern.permute.xlu0 %v3337_v12  ;;  %v940_v50 = vmul.f32 %v2547_v10, %v936_v46  ;;  %v3339_v26 = vld [vmem:[#allocation9_spill] sm:$0xff] }
 0x273   : > { %v938_v22 = vmul.f32 %v2547_v10, %v932_v54  ;;  %1998 = vset.pattern.permute.xlu2 %v3327_v32  ;;  %v855_v55 = vmul.f32 %v3339_v26, %v831_v40 }
 0x274   : > { %v856_v52 = vmul.f32 %v2786_v7, %v832_v51  ;;  %v960_v31 = vmul.f32 %v2636_v24, %v940_v50 }
 0x275   : > { %v958_v19 = vmul.f32 %v2817_v36, %v938_v22 }
 0x276   : > { %v892_v27 = vadd.f32 %v888_v57, %v856_v52 }
 0x277   : > { %v2885_v45 = vadd.f32 %v958_v19, %v926_v29 }
 0x278   : > { %v928_v14 = vadd.f32 %v924_v34, %v892_v27  ;;  %1137 = vrot.lane.b32.xlu1 %v2744_v47, %s3328_s26 }
 0x279   : > { %v972_v16 = vpop.permute.xlu2 %971  ;;  %1302 = vperm.xlu0 %2015, %v2414_v25   ;;  %v1027_v7 = vpop.permute.xlu0 %1026  ;;  %1997 = vset.pattern.permute.xlu1 %v3325_v53 }
 0x27a   : > { %v964_v36 = vadd.f32 %v960_v31, %v928_v14  ;;  %v976_v60 = vmul.f32 %v2553_v4, %v972_v16  ;;  %v862_v29 = vpop.permute.xlu1 %861  ;;  %1097 = vrot.lane.b32.xlu2 %v2722_v39, %s3332_s19 }
 0x27b   : > { %v867_v24 = vmul.f32 %v2536_v13, %v862_v29  ;;  %v3341_v13 = vmov 14  }
 0x27c   : > { %v996_v46 = vmul.f32 %v991_v48, %v976_v60 }
 0x27d   : > { %v887_v15 = vmul.f32 %v2755_v0, %v867_v24 }
 0x27e   : > { %v1000_v28 = vadd.f32 %v996_v46, %v964_v36 }
 0x27f   : > { %v891_v51 = vadd.f32 %v887_v15, %v855_v55 }
 0x280   : > { %1078 = vperm.xlu1 %1997, %v2695_v20  }
 0x281   : > { %v1008_v54 = vpop.permute.xlu2 %1007  ;;  %1277 = vrot.lane.b32.xlu0 %v2722_v39, %s3340_s28  ;;  %v2903_v53 = vpop.permute.xlu0 %1001 }
 0x282   : > { %v1012_v22 = vmul.f32 %v2562_v1, %v1008_v54  ;;  %v898_v57 = vpop.permute.xlu1 %897  ;;  %1154 = vperm.xlu2 %1998, %v3311_v6   ;;  %2019 = vset.pattern.permute.xlu0 %v3341_v13 }
 0x283   : > { %v903_v48 = vmul.f32 %v2531_v23, %v898_v57 }
 0x284   : > { %v1032_v0 = vmul.f32 %v1027_v7, %v1012_v22 }
 0x285   : > { %v923_v50 = vmul.f32 %v2765_v63, %v903_v48 }
 0x286   : > { %v1036_v52 = vadd.f32 %v1032_v0, %v1000_v28  ;;  %v3342_v28 = vld [vmem:[#allocation6_spill] sm:$0xff] }
 0x287   : > { %v927_v19 = vadd.f32 %v923_v50, %v891_v51 }
 0x288   : > { %1099 = vrot.lane.b32.xlu1 %v2734_v42, %s3332_s19 }
 0x289   : > { %v1044_v56 = vpop.permute.xlu2 %1043  ;;  %v1063_v34 = vpop.permute.xlu0 %1062  ;;  %2000 = vset.pattern.permute.xlu1 %v3335_v43  ;;  %1338 = vperm.xlu0 %2019, %v2414_v25  }
 0x28a   : > { %v1048_v27 = vmul.f32 %v2571_v18, %v1044_v56  ;;  %v934_v31 = vpop.permute.xlu1 %933  ;;  %1175 = vrot.lane.b32.xlu2 %v2753_v2, %s3330_s18 }
 0x28b   : > { %v939_v23 = vmul.f32 %v2547_v10, %v934_v31  ;;  %2001 = vset.pattern.permute.xlu2 %v3335_v43 }
 0x28c   : > { %v1068_v63 = vmul.f32 %v1063_v34, %v1048_v27 }
 0x28d   : > { %v959_v14 = vmul.f32 %v2784_v58, %v939_v23 }
 0x28e   : > { %v2920_v40 = vadd.f32 %v1068_v63, %v1036_v52 }
 0x28f   : > { %v963_v16 = vadd.f32 %v959_v14, %v927_v19 }
 0x290   : > { %1173 = vrot.lane.b32.xlu1 %v2744_v47, %s3330_s18 }
 0x291   : > { %v983_v25 = vpop.permute.xlu2 %982  ;;  %1326 = vperm.xlu0 %2019, %v2457_v38  }
 0x292   : > { %v970_v7 = vpop.permute.xlu1 %969  ;;  %1114 = vperm.xlu2 %2001, %v2695_v20  }
 0x293   : > { %v975_v36 = vmul.f32 %v2553_v4, %v970_v7 }
 0x295   : > { %v995_v10 = vmul.f32 %v2803_v61, %v975_v36  ;;  %v1055_v61 = vpop.permute.xlu0 %1054 }
 0x297   : > { %v999_v43 = vadd.f32 %v995_v10, %v963_v16 }
 0x298   : > { %1110 = vperm.xlu1 %2000, %v2457_v38  }
 0x299   : > { %2024 = vset.pattern.permute.xlu0 %v3310_v11 }
 0x29a   : > { %v1006_v58 = vpop.permute.xlu1 %1005  ;;  %2002 = vset.pattern.permute.xlu2 %v3329_v59  ;;  %1360 = vperm.xlu0 %2024, %v2645_v33   ;;  %v1059_v29 = vpop.permute.xlu2 %1058 }
 0x29b   : > { %v1011_v60 = vmul.f32 %v2562_v1, %v1006_v58  ;;  %1190 = vperm.xlu2 %2002, %v3311_v6  }
 0x29d   : > { %v1031_v24 = vmul.f32 %v2844_v3, %v1011_v60  ;;  %v1083_v48 = vpop.permute.xlu0 %1082 }
 0x29e   : > { %v1091_v19 = vmul.f32 %v1083_v48, %v2744_v47 }
 0x29f   : > { %v1035_v46 = vadd.f32 %v1031_v24, %v999_v43 }
 0x2a0   : > { %1135 = vrot.lane.b32.xlu1 %v2734_v42, %s3328_s26  ;;  %s3343_s26 = smov 121  }
 0x2a1   : > { %2004 = vset.pattern.permute.xlu1 %v3327_v32 }
 0x2a2   : > { %v968_v26 = vpop.permute.xlu1 %967  ;;  %2028 = vset.pattern.permute.xlu0 %v3312_v21 }
 0x2a3   : > { %v974_v55 = vmul.f32 %v2553_v4, %v968_v26  ;;  %1211 = vrot.lane.b32.xlu2 %v2753_v2, %s3333_s25  ;;  %v1019_v15 = vpop.permute.xlu2 %1018  ;;  %1668 = vperm.xlu0 %2028, %v3342_v28  }
 0x2a4   : > { %2005 = vset.pattern.permute.xlu2 %v3327_v32 }
 0x2a5   : > { %v994_v3 = vmul.f32 %v983_v25, %v974_v55  ;;  %v1075_v36 = vpop.permute.xlu0 %1074 }
 0x2a7   : > { %v998_v51 = vadd.f32 %v994_v3, %v2885_v45  ;;  %v973_v45 = vmul.f32 %v2553_v4, %v2863_v17 }
 0x2a8   : > { %1209 = vrot.lane.b32.xlu1 %v2744_v47, %s3333_s25 }
 0x2aa   : > { %v1042_v54 = vpop.permute.xlu1 %1041 }
 0x2ab   : > { %v1047_v22 = vmul.f32 %v2571_v18, %v1042_v54  ;;  %1150 = vperm.xlu2 %2005, %v2695_v20   ;;  %v1040_v57 = vpop.permute.xlu2 %1039 }
 0x2ac   : > { %v1046_v0 = vmul.f32 %v2571_v18, %v1040_v57 }
 0x2ad   : > { %v1067_v50 = vmul.f32 %v1059_v29, %v1047_v22  ;;  %v1159_v24 = vpop.permute.xlu0 %1158 }
 0x2ae   : > { %v1066_v52 = vmul.f32 %v1055_v61, %v1046_v0 }
 0x2af   : > { %v1071_v32 = vadd.f32 %v1067_v50, %v1035_v46  ;;  %v1089_v46 = vmul.f32 %v1075_v36, %v2722_v39 }
 0x2b0   : > { %1146 = vperm.xlu1 %2004, %v2457_v38  }
 0x2b1   : > { %v1095_v56 = vadd.f32 %v1091_v19, %v1071_v32 }
 0x2b2   : > { %v979_v34 = vpop.permute.xlu1 %978 }
 0x2b3   : > { %v993_v27 = vmul.f32 %v979_v34, %v973_v45  ;;  %2006 = vset.pattern.permute.xlu2 %v3331_v35  ;;  %v1102_v31 = vpop.permute.xlu2 %1101 }
 0x2b4   : > { %1226 = vperm.xlu2 %2006, %v3311_v6   ;;  %v1009_v6 = vmul.f32 %v2562_v1, %v2903_v53  ;;  %v2059_v53 = vld [vmem:[%s3223_s3 + $0x10] sm:$0xff] }
 0x2b5   : > { %v997_v23 = vadd.f32 %v993_v27, %v2849_v41  ;;  %v2994_v22 = vpop.permute.xlu0 %1133 }
 0x2b8   : > { %1171 = vrot.lane.b32.xlu1 %v2734_v42, %s3330_s18 }
 0x2b9   : > { %2008 = vset.pattern.permute.xlu1 %v3329_v59 }
 0x2ba   : > { %v1004_v63 = vpop.permute.xlu1 %1003 }
 0x2bb   : > { %v1010_v14 = vmul.f32 %v2562_v1, %v1004_v63  ;;  %v1051_v16 = vpop.permute.xlu2 %1050 }
 0x2bc   : > { %1247 = vrot.lane.b32.xlu2 %v2753_v2, %s3336_s20 }
 0x2bd   : > { %v1030_v4 = vmul.f32 %v1019_v15, %v1010_v14  ;;  %2009 = vset.pattern.permute.xlu2 %v3329_v59  ;;  %v1195_v34 = vpop.permute.xlu0 %1194 }
 0x2bf   : > { %v1034_v17 = vadd.f32 %v1030_v4, %v998_v51 }
 0x2c0   : > { %1245 = vrot.lane.b32.xlu1 %v2744_v47, %s3336_s20 }
 0x2c1   : > { %v2968_v41 = vadd.f32 %v1066_v52, %v1034_v17 }
 0x2c2   : > { %v1015_v25 = vpop.permute.xlu1 %1014 }
 0x2c3   : > { %v1029_v7 = vmul.f32 %v1015_v25, %v1009_v6 }
 0x2c4   : > { %1186 = vperm.xlu2 %2009, %v2695_v20   ;;  %v1123_v10 = vpop.permute.xlu2 %1122 }
 0x2c5   : > { %v1033_v43 = vadd.f32 %v1029_v7, %v997_v23  ;;  %v3011_v17 = vpop.permute.xlu0 %1169 }
 0x2c8   : > { %1182 = vperm.xlu1 %2008, %v2457_v38  }
 0x2ca   : > { %v1038_v58 = vpop.permute.xlu1 %1037 }
 0x2cb   : > { %v1045_v59 = vmul.f32 %v2571_v18, %v1038_v58 }
 0x2cc   : > { %2010 = vset.pattern.permute.xlu2 %v3334_v30  ;;  %v1140_v60 = vpop.permute.xlu2 %1139 }
 0x2cd   : > { %v1065_v29 = vmul.f32 %v1051_v16, %v1045_v59  ;;  %v1144_v1 = vmul.f32 %v2587_v44, %v1140_v60  ;;  %1262 = vperm.xlu2 %2010, %v2059_v53  }
 0x2cf   : > { %v1069_v61 = vadd.f32 %v1065_v29, %v1033_v43  ;;  %v1164_v26 = vmul.f32 %v1159_v24, %v1144_v1  ;;  %v1231_v43 = vpop.permute.xlu0 %1230 }
 0x2d0   : > { %1207 = vrot.lane.b32.xlu1 %v2734_v42, %s3333_s25  ;;  %s1723_s25 = scalar_lea.sflag [#allocation4], %s2290_s15 }
 0x2d1   : > { %2012 = vset.pattern.permute.xlu1 %v3331_v35  ;;  %v2982_v18 = vadd.f32 %v1089_v46, %v1069_v61 }
 0x2d2   : > { %v1087_v55 = vpop.permute.xlu1 %1086 }
 0x2d3   : > { %v1092_v15 = vmul.f32 %v1087_v55, %v2753_v2 }
 0x2d4   : > { %v2985_v28 = vpop.permute.xlu2 %1097 }
 0x2d5   : > { %v1096_v3 = vadd.f32 %v1092_v15, %v2920_v40  ;;  %1283 = vrot.lane.b32.xlu2 %v2753_v2, %s3340_s28  ;;  %v1107_v40 = vmul.f32 %v2578_v9, %v1102_v31 }
 0x2d6   : > { %2013 = vset.pattern.permute.xlu2 %v3331_v35 }
 0x2d8   : > { %1281 = vrot.lane.b32.xlu1 %v2744_v47, %s3340_s28 }
 0x2da   : > { %v1104_v51 = vpop.permute.xlu1 %1103 }
 0x2db   : > { %v1108_v54 = vmul.f32 %v2578_v9, %v1104_v51 }
 0x2dc   : > { %v1155_v57 = vpop.permute.xlu2 %1154 }
 0x2dd   : > { %v1128_v48 = vmul.f32 %v1123_v10, %v1108_v54  ;;  %1222 = vperm.xlu2 %2013, %v2695_v20  }
 0x2df   : > { %v1132_v0 = vadd.f32 %v1128_v48, %v1096_v3  ;;  %v1141_v48 = vmul.f32 %v2587_v44, %v2994_v22 }
 0x2e0   : > { %1218 = vperm.xlu1 %2012, %v2457_v38  }
 0x2e1   : > { %v1168_v50 = vadd.f32 %v1164_v26, %v1132_v0  ;;  %v2061_v0 = vld [vmem:[%s3229_s9 + $0x10] sm:$0xff] }
 0x2e2   : > { %v1119_v52 = vpop.permute.xlu1 %1118 }
 0x2e3   : > { %v1127_v35 = vmul.f32 %v1119_v52, %v1107_v40 }
 0x2e4   : > { %v1176_v19 = vpop.permute.xlu2 %1175 }
 0x2e5   : > { %v1131_v32 = vadd.f32 %v1127_v35, %v1095_v56  ;;  %v1180_v45 = vmul.f32 %v2597_v37, %v1176_v19  ;;  %2014 = vset.pattern.permute.xlu2 %v3337_v12  ;;  %v1206_v19 = vpop.permute.xlu0 %1205 }
 0x2e6   : > { %1298 = vperm.xlu2 %2014, %v2059_v53  }
 0x2e7   : > { %v1200_v27 = vmul.f32 %v1195_v34, %v1180_v45  ;;  %v1177_v34 = vmul.f32 %v2597_v37, %v3011_v17 }
 0x2e8   : > { %1243 = vrot.lane.b32.xlu1 %v2734_v42, %s3336_s20 }
 0x2e9   : > { %v1204_v23 = vadd.f32 %v1200_v27, %v1168_v50  ;;  %2016 = vset.pattern.permute.xlu1 %v3334_v30 }
 0x2ea   : > { %v1138_v38 = vpop.permute.xlu1 %1137 }
 0x2eb   : > { %v1143_v31 = vmul.f32 %v2587_v44, %v1138_v38 }
 0x2ec   : > { %v1115_v63 = vpop.permute.xlu2 %1114 }
 0x2ed   : > { %v1163_v14 = vmul.f32 %v1155_v57, %v1143_v31  ;;  %v1267_v27 = vpop.permute.xlu0 %1266 }
 0x2ee   : > { %1319 = vrot.lane.b32.xlu2 %v2753_v2, %s3343_s26  ;;  %v2060_v2 = vld [vmem:[%s3223_s3] sm:$0xff] }
 0x2ef   : > { %v1167_v56 = vadd.f32 %v1163_v14, %v1131_v32  ;;  %2017 = vset.pattern.permute.xlu2 %v3334_v30 }
 0x2f0   : > { %1317 = vrot.lane.b32.xlu1 %v2744_v47, %s3343_s26 }
 0x2f2   : > { %v1079_v16 = vpop.permute.xlu1 %1078 }
 0x2f3   : > { %v1090_v4 = vmul.f32 %v1079_v16, %v2734_v42 }
 0x2f5   : > { %v1094_v6 = vadd.f32 %v1090_v4, %v2968_v41  ;;  %v1191_v25 = vpop.permute.xlu2 %1190 }
 0x2f6   : > { %1258 = vperm.xlu2 %2017, %v2695_v20  }
 0x2f8   : > { %1254 = vperm.xlu1 %2016, %v2060_v2  }
 0x2fa   : > { %v1100_v7 = vpop.permute.xlu1 %1099 }
 0x2fb   : > { %v1106_v30 = vmul.f32 %v2578_v9, %v1100_v7 }
 0x2fd   : > { %v1126_v36 = vmul.f32 %v1115_v63, %v1106_v30  ;;  %v1212_v47 = vpop.permute.xlu2 %1211  ;;  %v1242_v63 = vpop.permute.xlu0 %1241 }
 0x2fe   : > { %v1216_v10 = vmul.f32 %v2613_v5, %v1212_v47  ;;  %2018 = vset.pattern.permute.xlu2 %v3341_v13 }
 0x2ff   : > { %v1130_v58 = vadd.f32 %v1126_v36, %v1094_v6  ;;  %1334 = vperm.xlu2 %2018, %v2059_v53   ;;  %v1105_v53 = vmul.f32 %v2578_v9, %v2985_v28 }
 0x300   : > { %v1236_v41 = vmul.f32 %v1231_v43, %v1216_v10  ;;  %1279 = vrot.lane.b32.xlu1 %v2734_v42, %s3340_s28  ;;  %v2062_v10 = vld [vmem:[%s3308_s1 + $0xc] ss:$0 sm:$0xff]  ;;  %s1859_s28 = sshll.u32 %s3345_s2, 3 }
 0x301   : > { %2020 = vset.pattern.permute.xlu1 %v3337_v12 }
 0x302   : > { %v3024_v59 = vadd.f32 %v1236_v41, %v1204_v23  ;;  %v1174_v60 = vpop.permute.xlu1 %1173 }
 0x303   : > { %v1179_v29 = vmul.f32 %v2597_v37, %v1174_v60 }
 0x305   : > { %v1199_v1 = vmul.f32 %v1191_v25, %v1179_v29  ;;  %v1151_v24 = vpop.permute.xlu2 %1150  ;;  %v1303_v6 = vpop.permute.xlu0 %1302  ;;  %v1213_v25 = vmul.f32 %v2613_v5, %v1206_v19  ;;  %v1249_v19 = vmul.f32 %v2062_v10, %v1242_v63 }
 0x307   : > { %v1203_v46 = vadd.f32 %v1199_v1, %v1167_v56  ;;  %2021 = vset.pattern.permute.xlu2 %v3337_v12 }
 0x308   : > { %1290 = vperm.xlu1 %2020, %v2060_v2   ;;  %1294 = vperm.xlu2 %2021, %v2695_v20  }
 0x30a   : > { %v1111_v61 = vpop.permute.xlu1 %1110 }
 0x30b   : > { %v1125_v26 = vmul.f32 %v1111_v61, %v1105_v53 }
 0x30d   : > { %v1129_v55 = vadd.f32 %v1125_v26, %v2982_v18  ;;  %v1278_v30 = vpop.permute.xlu0 %1277 }
 0x30e   : > { %v1227_v15 = vpop.permute.xlu2 %1226 }
 0x310   : > { %1313 = vrot.lane.b32.xlu1 %v2722_v39, %s3343_s26  ;;  %1315 = vrot.lane.b32.xlu2 %v2734_v42, %s3343_s26  ;;  %s1733_s26 = scalar_lea.hbm %s3232_s12, %s1859_s28 }
 0x311   : > { %2022 = vset.pattern.permute.xlu1 %v3341_v13  ;;  %2023 = vset.pattern.permute.xlu2 %v3310_v11  ;;  %v3344_v13 = vld [vmem:[#allocation11_spill] sm:$0xff]  ;;  %s1736_s19 = sshll.u32 %s1733_s26, 4  ;;  %s1737_s19 = int_to_ptr.hbm [resolvable:$true] %s1736_s19 }
 0x312   : > { %v1136_v12 = vpop.permute.xlu1 %1135  ;;  %s2081_s20 = sshra.s32 %s1737_s19, 4  ;;  %s2082_s20 = int_to_ptr.hbm [resolvable:$true] %s2081_s20 }
 0x313   : > { %v1142_v3 = vmul.f32 %v2587_v44, %v1136_v12  ;;  %p2088_p2 = scmp.lt.s32.totalorder %s2082_s20, %s3232_s12 }
 0x315   : > { %v1162_v51 = vmul.f32 %v1151_v24, %v1142_v3  ;;  %v1339_v24 = vpop.permute.xlu0 %1338 }
 0x316   : > { %v1248_v9 = vpop.permute.xlu2 %1247 }
 0x317   : > { %v1166_v28 = vadd.f32 %v1162_v51, %v1130_v58  ;;  %v1252_v43 = vmul.f32 %v2062_v10, %v1248_v9 }
 0x318   : > { %1330 = vperm.xlu1 %2022, %v2695_v20   ;;  %1356 = vperm.xlu2 %2023, %v2682_v62  }
 0x319   : > { %v1272_v29 = vmul.f32 %v1267_v27, %v1252_v43 }
 0x31a   : > { %v1210_v18 = vpop.permute.xlu1 %1209 }
 0x31b   : > { %v1215_v39 = vmul.f32 %v2613_v5, %v1210_v18  ;;  %v1276_v26 = vadd.f32 %v1272_v29, %v3024_v59  ;;  %v1421_v59 = vld [vmem:[%s3230_s10 + $0x70] sm:$0xff]  ;;  %v1407_v29 = vld [vmem:[%s3230_s10] sm:$0xff] }
 0x31d   : > { %v1235_v54 = vmul.f32 %v1227_v15, %v1215_v39 }
 0x31e   : > { %v1187_v42 = vpop.permute.xlu2 %1186 }
 0x31f   : > { %v1239_v57 = vadd.f32 %v1235_v54, %v1203_v46 }
 0x320   : > { %2025 = vset.pattern.permute.xlu1 %v3310_v11  ;;  %1368 = vperm.xlu2 %2023, %v3344_v13  }
 0x321   : > { %1364 = vperm.xlu1 %2025, %v2061_v0  }
 0x322   : > { %v1147_v20 = vpop.permute.xlu1 %1146 }
 0x323   : > { %v1161_v40 = vmul.f32 %v1147_v20, %v1141_v48  ;;  %v1419_v48 = vld [vmem:[%s3230_s10 + $0x60] sm:$0xff]  ;;  %v1418_v20 = vld [vmem:[%s3230_s10 + $0x58] sm:$0xff] }
 0x325   : > { %v1165_v50 = vadd.f32 %v1161_v40, %v1129_v55 }
 0x327   : > { %v1263_v11 = vpop.permute.xlu2 %1262 }
 0x328   : > { %2027 = vset.pattern.permute.xlu2 %v3312_v21 }
 0x329   : > { %2026 = vset.pattern.permute.xlu1 %v3312_v21  ;;  %1664 = vperm.xlu2 %2027, %v2645_v33  }
 0x32a   : > { %v1172_v52 = vpop.permute.xlu1 %1171  ;;  %1660 = vperm.xlu1 %2026, %v2682_v62  }
 0x32b   : > { %v1178_v44 = vmul.f32 %v2597_v37, %v1172_v52  ;;  %v1415_v52 = vld [vmem:[%s3230_s10 + $0x40] sm:$0xff] }
 0x32d   : > { %v1198_v22 = vmul.f32 %v1187_v42, %v1178_v44 }
 0x32f   : > { %v1202_v35 = vadd.f32 %v1198_v22, %v1166_v28  ;;  %v1284_v45 = vpop.permute.xlu2 %1283 }
 0x330   : > { %v1288_v41 = vmul.f32 %v2625_v49, %v1284_v45 }
 0x332   : > { %v1246_v32 = vpop.permute.xlu1 %1245  ;;  %1672 = vperm.xlu1 %2026, %v3344_v13   ;;  %v1308_v46 = vmul.f32 %v1303_v6, %v1288_v41  ;;  %v1422_v13 = vld [vmem:[%s3230_s10 + $0x78] sm:$0xff]  ;;  %v1864_v41 = vld [vmem:[%s3225_s5] sm:$0xff] }
 0x333   : > { %v1251_v58 = vmul.f32 %v2062_v10, %v1246_v32  ;;  %1423 = vmatpush.msra.mxu2 %v1422_v13  ;;  %v2063_v32 = vld [vmem:[%s3308_s1 + $0xd] ss:$0 sm:$0xff]  ;;  %v1477_v13 = vld [vmem:[%s3228_s8] sm:$0xff] }
 0x334   : > { %v1312_v9 = vadd.f32 %v1308_v46, %v1276_v26  ;;  %v1285_v27 = vmul.f32 %v2063_v32, %v1278_v30 }
 0x335   : > { %1424 = vmatpush.msra.mxu2 %v1421_v59  ;;  %v1478_v59 = vld [vmem:[%s3228_s8 + $0x8] sm:$0xff] }
 0x337   : > { %v1223_v38 = vpop.permute.xlu2 %1222 }
 0x33a   : > { %v1183_v21 = vpop.permute.xlu1 %1182 }
 0x33b   : > { %v1197_v23 = vmul.f32 %v1183_v21, %v1177_v34  ;;  %v1413_v34 = vld [vmem:[%s3230_s10 + $0x30] sm:$0xff] }
 0x33d   : > { %v1201_v33 = vadd.f32 %v1197_v23, %v1165_v50  ;;  %v1417_v50 = vld [vmem:[%s3230_s10 + $0x50] sm:$0xff] }
 0x340   : > { %v1299_v16 = vpop.permute.xlu2 %1298 }
 0x342   : > { %v1208_v31 = vpop.permute.xlu1 %1207 }
 0x343   : > { %v1214_v62 = vmul.f32 %v2613_v5, %v1208_v31  ;;  %v1271_v5 = vmul.f32 %v1263_v11, %v1251_v58  ;;  %v1416_v11 = vld [vmem:[%s3230_s10 + $0x48] sm:$0xff] }
 0x344   : > { %v1412_v31 = vld [vmem:[%s3230_s10 + $0x28] sm:$0xff] }
 0x345   : > { %v1234_v14 = vmul.f32 %v1223_v38, %v1214_v62  ;;  %v1275_v55 = vadd.f32 %v1271_v5, %v1239_v57  ;;  %v1420_v57 = vld [vmem:[%s3230_s10 + $0x68] sm:$0xff] }
 0x346   : > { %1425 = vmatpush.msra.mxu2 %v1420_v57  ;;  %v1408_v58 = vld [vmem:[%s3230_s10 + $0x8] sm:$0xff]  ;;  %v1479_v57 = vld [vmem:[%s3228_s8 + $0x10] sm:$0xff] }
 0x347   : > { %v3058_v56 = vadd.f32 %v1234_v14, %v1202_v35  ;;  %v1414_v35 = vld [vmem:[%s3230_s10 + $0x38] sm:$0xff]  ;;  %v1327_v14 = vpop.permute.xlu0 %1326 }
 0x348   : > { %v1320_v2 = vpop.permute.xlu2 %1319  ;;  %1426 = vmatpush.msra.mxu2 %v1419_v48  ;;  %v1480_v48 = vld [vmem:[%s3228_s8 + $0x18] sm:$0xff] }
 0x349   : > { %v1324_v1 = vmul.f32 %v2673_v8, %v1320_v2 }
 0x34a   : > { %v1282_v4 = vpop.permute.xlu1 %1281  ;;  %1427 = vmatpush.msra.mxu2 %v1418_v20  ;;  %v2065_v20 = vld [vmem:[%s2296_s17] sm:$0xff] }
 0x34b   : > { %v1287_v60 = vmul.f32 %v2625_v49, %v1282_v4  ;;  %v1344_v15 = vmul.f32 %v1339_v24, %v1324_v1 }
 0x34c   : > { %1428 = vmatpush.msra.mxu2 %v1417_v50 }
 0x34d   : > { %v1307_v53 = vmul.f32 %v1299_v16, %v1287_v60  ;;  %v1348_v18 = vadd.f32 %v1344_v15, %v1312_v9  ;;  %v1411_v16 = vld [vmem:[%s3230_s10 + $0x20] sm:$0xff]  ;;  %v1865_v60 = vld [vmem:[%s3225_s5 + $0x8] sm:$0xff] }
 0x34e   : > { %1429 = vmatpush.msra.mxu2 %v1416_v11  ;;  %v1866_v11 = vld [vmem:[%s3226_s6] sm:$0xff] }
 0x34f   : > { %v1311_v51 = vadd.f32 %v1307_v53, %v1275_v55  ;;  %v1361_v46 = vpop.permute.xlu0 %1360 }
 0x350   : > { %v1259_v36 = vpop.permute.xlu2 %1258  ;;  %1430 = vmatpush.msra.mxu2 %v1415_v52 }
 0x352   : > { %v1219_v7 = vpop.permute.xlu1 %1218  ;;  %1431 = vmatpush.msra.mxu2 %v1414_v35 }
 0x353   : > { %v1233_v37 = vmul.f32 %v1219_v7, %v1213_v25 }
 0x354   : > { %1432 = vmatpush.msra.mxu2 %v1413_v34 }
 0x355   : > { %v3061_v17 = vadd.f32 %v1233_v37, %v1201_v33  ;;  %v1410_v37 = vld [vmem:[%s3230_s10 + $0x18] sm:$0xff] }
 0x356   : > { %1433 = vmatpush.msra.mxu2 %v1412_v31 }
 0x358   : > { %1434 = vmatpush.msra.mxu2 %v1411_v16 }
 0x359   : > { %v1335_v3 = vpop.permute.xlu2 %1334 }
 0x35a   : > { %v1244_v47 = vpop.permute.xlu1 %1243  ;;  %1435 = vmatpush.msra.mxu2 %v1410_v37 }
 0x35b   : > { %v1250_v44 = vmul.f32 %v2062_v10, %v1244_v47 }
 0x35d   : > { %v1270_v21 = vmul.f32 %v1259_v36, %v1250_v44 }
 0x35f   : > { %v1274_v4 = vadd.f32 %v1270_v21, %v3058_v56  ;;  %v1409_v56 = vld [vmem:[%s3230_s10 + $0x10] sm:$0xff] }
 0x360   : > { %1436 = vmatpush.msra.mxu2 %v1409_v56 }
 0x362   : > { %v1318_v61 = vpop.permute.xlu1 %1317  ;;  %v1295_v40 = vpop.permute.xlu2 %1294  ;;  %1437 = vmatpush.msra.mxu2 %v1408_v58 }
 0x363   : > { %v1323_v12 = vmul.f32 %v2673_v8, %v1318_v61 }
 0x364   : > { %1438 = vmatpush.msra.mxu2 %v1407_v29 }
 0x365   : > { %v1343_v28 = vmul.f32 %v1335_v3, %v1323_v12 }
 0x367   : > { %v1347_v49 = vadd.f32 %v1343_v28, %v1311_v51 }
 0x369   : > { %v1354_v39 = vpack.c.bf16 %v1348_v18, %v1347_v49 }
 0x36a   : > { %v1255_v54 = vpop.permute.xlu1 %1254  ;;  %v1316_v38 = vpop.permute.xlu2 %1315 }
 0x36b   : > { %1394 = vmatpush.bf16.msra.mxu1 %v1354_v39  ;;  %1868 = vmatpush.bf16.msra.mxu3 %v1354_v39  ;;  %v1269_v23 = vmul.f32 %v1255_v54, %v1249_v19  ;;  %v1452_v39 = vld [vmem:[%s3227_s7] sm:$0x3] }
 0x36d   : > { %v1273_v6 = vadd.f32 %v1269_v23, %v3061_v17 }
 0x372   : > { %v1280_v42 = vpop.permute.xlu1 %1279  ;;  %v1357_v5 = vpop.permute.xlu2 %1356 }
 0x373   : > { %v1286_v45 = vmul.f32 %v2063_v32, %v1280_v42 }
 0x375   : > { %v1306_v62 = vmul.f32 %v1295_v40, %v1286_v45  ;;  %v2066_v40 = vld [vmem:[%s2296_s17 + $0x8] sm:$0xff]  ;;  %s1812_s17 = sshll.u32 %s2290_s15, 5 }
 0x376   : > { %v1658_v50 = vpack.c.bf16 %v2066_v40, %v2065_v20  ;;  %s450_s0 = scalar_lea.vmem [#allocation3], %s1812_s17  ;;  %s2083_s17 = scalar_lea.hbm %s2082_s20, 32 }
 0x377   : > { %v1310_v36 = vadd.f32 %v1306_v62, %v1274_v4  ;;  %s1734_s18 = sshll.u32 %s450_s0, 4  ;;  %p2084_p13 = scmp.ne.s32.totalorder %s2082_s20, %s2083_s17  ;;  %s1735_s18 = int_to_ptr.vmem [resolvable:$true] %s1734_s18 }
 0x378   : > { %p2089_p3 = scmp.lt.s32.totalorder %s2087_s16, %s2083_s17 }
 0x379   : > { %p2085_p0 = pnand %p2084_p13, %p2266_p6 }
 0x37a   : > { %v1291_v0 = vpop.permute.xlu1 %1290  ;;  %v1369_v3 = vpop.permute.xlu2 %1368  ;;  %p2090_p4 = por %p2089_p3, %p2088_p2 }
 0x37b   : > { %v1305_v63 = vmul.f32 %v1291_v0, %v1285_v27  ;;  %v1603_v0 = vld [vmem:[%s3231_s11] sm:$0x1]  ;;  %p2086_p1 = pneg %p2085_p0 }
 0x37c   : > { %1843 = vmatpush.msk.msrb.mxu0 %vm1617_vm4, %v1603_v0 }
 0x37d   : > { %v1309_v30 = vadd.f32 %v1305_v63, %v1273_v6  ;;  %p2091_p5 = pnand %p2090_p4, %p2086_p1 }
 0x382   : > { %v1314_v22 = vpop.permute.xlu1 %1313 }
 0x383   : > { %v1321_v33 = vmul.f32 %v2673_v8, %v1314_v22  ;;  %v2064_v8 = vld [vmem:[%s3308_s1 + $0xe] ss:$0 sm:$0xff] }
 0x384   : > { %v1322_v25 = vmul.f32 %v2064_v8, %v1316_v38  ;;  %v1867_v22 = vld [vmem:[%s3226_s6 + $0x8] sm:$0xff] }
 0x385   : > { %v1341_v2 = vmul.f32 %v1327_v14, %v1321_v33 }
 0x387   : > { %v1345_v10 = vadd.f32 %v1341_v2, %v1309_v30 }
 0x38a   : > { %v1331_v7 = vpop.permute.xlu1 %1330 }
 0x38b   : > { %v1342_v47 = vmul.f32 %v1331_v7, %v1322_v25 }
 0x38d   : > { %v1346_v17 = vadd.f32 %v1342_v47, %v1310_v36 }
 0x38f   : > { %v1353_v43 = vpack.c.bf16 %v1346_v17, %v1345_v10 }
 0x391   : > { %1395 = vmatpush.bf16.msra.mxu1 %v1353_v43  ;;  %1869 = vmatpush.bf16.msra.mxu3 %v1353_v43 }
 0x393   : > { %v1365_v55 = vpop.permute.xlu1 %1364 }
 0x394   : > { %1831 = vmatmul.msk.bf16.vlgmr.msra.gmra.mxu1 %vm1381_vm1, %v1864_v41  ;;  %1832 = vmatmul.msk.bf16.vlgmr.msra.gmra.mxu3 %vm1381_vm1, %v1865_v60 }
 0x395   : > { %1698 = vmatpush.bf16.msrb.mxu1 %v1658_v50 }
 0x39c   : > { %v1661_v50 = vpop.permute.xlu1 %1660 }
 0x3a4   : > { %1856 = vmatmul.msk.bf16.vlgmr.msrb.gmra.mxu1 %vm791_vm0, %v1866_v11 }
 0x3b4   : > { %1857 = vmatmul.msk.bf16.gmra.mxu1 %vm791_vm0, %v1867_v22 }
 0x411   : > { %v1397_v1 = vpop.f32.mrf.mxu1 }
 0x412   : > { %v3136_v24 = vadd.f32 %v1397_v1, %v1357_v5 }
 0x414   : > { %1439 = vmatmul.f32.vlgmr.msra.gmra.mxu2 %v3136_v24 }
 0x417   : > { %v1402_v26 = vpop.f32.mrf.mxu3 }
 0x418   : > { %v3142_v15 = vadd.f32 %v1402_v26, %v1365_v55 }
 0x419   : > { %v1399_v53 = vpop.f32.mrf.mxu1 }
 0x41a   : > { %v3139_v61 = vadd.f32 %v1399_v53, %v1361_v46 }
 0x41c   : > { %1442 = vmatmul.f32.gmra.mxu2 %v3139_v61 }
 0x41f   : > { %v1404_v12 = vpop.f32.mrf.mxu3 }
 0x420   : > { %v3145_v51 = vadd.f32 %v1404_v12, %v1369_v3 }
 0x421   : > { %v1700_v40 = vpop.f32.mrf.mxu1 }
 0x422   : > { %v1701_v11 = vadd.f32 %v1700_v40, %v1661_v50 }
 0x424   : > { %1445 = vmatmul.f32.gmra.mxu2 %v3142_v15 }
 0x429   : > { %v1702_v22 = vpop.f32.mrf.mxu1 }
 0x42c   : > { %1448 = vmatmul.f32.gmra.mxu2 %v3145_v51 }
 0x497   : > { %v1440_v9 = vpop.f32.mrf.mxu2 }
 0x49f   : > { %v1443_v28 = vpop.f32.mrf.mxu2 }
 0x4a7   : > { %v1446_v18 = vpop.f32.mrf.mxu2 }
 0x4af   : > { %v1449_v49 = vpop.f32.mrf.mxu2 }
 0x4b0   : > { %1468 = vmatpush.msrb.mxu3 %v1449_v49 }
 0x4b2   : > { %1469 = vmatpush.msrb.mxu3 %v1446_v18 }
 0x4b4   : > { %1470 = vmatpush.msrb.mxu3 %v1443_v28 }
 0x4b6   : > { %1471 = vmatpush.msrb.mxu3 %v1440_v9 }
 0x4b7   : > { %1833 = vmatmul.msk.f32.vlgmr.msrb.gmra.mxu3 %vm1381_vm1, %v1452_v39 }
 0x53a   : > { %v1473_v54 = vpop.f32.mrf.mxu3 }
 0x53b   : > { %v1476_v42 = vmax.f32 %v1473_v54, 0.0 }
 0x53d   : > { %1834 = vmatpush.msk.msra.mxu3 %vm1494_vm2, %v1476_v42 }
 0x53e   : > { %1835 = vmatmul.msk.f32.vlgmr.msra.gmra.mxu3 %vm1481_vm3, %v1477_v13 }
 0x546   : > { %1836 = vmatmul.msk.f32.gmra.mxu3 %vm1481_vm3, %v1478_v59 }
 0x54e   : > { %1837 = vmatmul.msk.f32.gmra.mxu3 %vm1481_vm3, %v1479_v57 }
 0x556   : > { %1838 = vmatmul.msk.f32.gmra.mxu3 %vm1481_vm3, %v1480_v48 }
 0x5c1   : > { %v1515_v52 = vpop.f32.mrf.mxu3 }
 0x5c2   : > { %v1839_v44 = vmul.f32 -1.442695, %v1515_v52 }
 0x5c4   : > { %2043 = vpow2.f32 %v1839_v44 }
 0x5c9   : > { %v1518_v35 = vpop.f32.mrf.mxu3 }
 0x5ca   : > { %v2044_v19 = vpop.eup %2043  ;;  %v1840_v32 = vmul.f32 -1.442695, %v1518_v35 }
 0x5cb   : > { %v1539_v45 = vadd.f32 1.0, %v2044_v19 }
 0x5cc   : > { %2045 = vpow2.f32 %v1840_v32  ;;  %v1665_v32 = vpop.permute.xlu2 %1664 }
 0x5cd   : > { %2047 = vrcp.f32 %v1539_v45  ;;  %v1554_v62 = vand.u32 2147483648, %v1539_v45  ;;  %v1552_v14 = vand.u32 2147483647, %v1539_v45  ;;  %vm1548_vm6 = vweird.f32 %v1539_v45 }
 0x5cf   : > { %v1555_v7 = vor.u32 1.1754944e-38, %v1554_v62  ;;  %vm1553_vm9 = vcmp.eq.f32.partialorder %v1552_v14, 8.507059e+37 }
 0x5d1   : > { %v1521_v34 = vpop.f32.mrf.mxu3 }
 0x5d2   : > { %v2046_v27 = vpop.eup %2045  ;;  %v1841_v21 = vmul.f32 -1.442695, %v1521_v34 }
 0x5d3   : > { %v2048_v23 = vpop.eup %2047  ;;  %v1540_v33 = vadd.f32 1.0, %v2046_v27  ;;  %v1703_v27 = vadd.f32 %v1702_v22, %v1665_v32 }
 0x5d4   : > { %2049 = vpow2.f32 %v1841_v21  ;;  %v1544_v38 = vmul.f32 %v2048_v23, %v1539_v45  ;;  %vm1549_vm5 = vweird.f32 %v2048_v23 }
 0x5d5   : > { %2051 = vrcp.f32 %v1540_v33  ;;  %vm1550_vm7 = vmor %vm1548_vm6, %vm1549_vm5  ;;  %v1569_v56 = vand.u32 2147483648, %v1540_v33  ;;  %v1567_v10 = vand.u32 2147483647, %v1540_v33  ;;  %vm1563_vm11 = vweird.f32 %v1540_v33 }
 0x5d6   : > { %v1545_v31 = vsub.f32 1.0, %v1544_v38 }
 0x5d7   : > { %v1570_v29 = vor.u32 1.1754944e-38, %v1569_v56  ;;  %vm1568_vm13 = vcmp.eq.f32.partialorder %v1567_v10, 8.507059e+37 }
 0x5d8   : > { %v1546_v63 = vmul.f32 %v2048_v23, %v1545_v31 }
 0x5d9   : > { %v1524_v16 = vpop.f32.mrf.mxu3 }
 0x5da   : > { %v2050_v4 = vpop.eup %2049  ;;  %v1842_v6 = vmul.f32 -1.442695, %v1524_v16  ;;  %v1547_v8 = vadd.f32 %v2048_v23, %v1546_v63  ;;  %v1673_v16 = vpop.permute.xlu1 %1672 }
 0x5db   : > { %v2052_v25 = vpop.eup %2051  ;;  %v1541_v2 = vadd.f32 1.0, %v2050_v4 }
 0x5dc   : > { %2053 = vpow2.f32 %v1842_v6  ;;  %v1551_v37 = vsel %vm1550_vm7, %v2048_v23, %v1547_v8  ;;  %v1559_v30 = vmul.f32 %v2052_v25, %v1540_v33  ;;  %vm1564_vm10 = vweird.f32 %v2052_v25  ;;  %v1669_v23 = vpop.permute.xlu0 %1668  ;;  %v1705_v33 = vpop.f32.mrf.mxu1 }
 0x5dd   : > { %2055 = vrcp.f32 %v1541_v2  ;;  %v1556_v36 = vsel %vm1553_vm9, %v1555_v7, %v1551_v37  ;;  %vm1565_vm12 = vmor %vm1563_vm11, %vm1564_vm10  ;;  %v1584_v26 = vand.u32 2147483648, %v1541_v2  ;;  %v1582_v12 = vand.u32 2147483647, %v1541_v2 }
 0x5de   : > { %1844 = vmatmul.msk.f32.vlgmr.msrb.gmra.mxu0 %vm1604_vm8, %v1556_v36  ;;  %v1560_v47 = vsub.f32 1.0, %v1559_v30  ;;  %vm1578_vm15 = vweird.f32 %v1541_v2  ;;  %v1706_v31 = vadd.f32 %v1705_v33, %v1669_v23 }
 0x5df   : > { %v1585_v28 = vor.u32 1.1754944e-38, %v1584_v26  ;;  %vm1583_vm1 = vcmp.eq.f32.partialorder %v1582_v12, 8.507059e+37 }
 0x5e0   : > { %v1561_v17 = vmul.f32 %v2052_v25, %v1560_v47 }
 0x5e2   : > { %v2054_v43 = vpop.eup %2053  ;;  %v1562_v58 = vadd.f32 %v2052_v25, %v1561_v17 }
 0x5e3   : > { %v2056_v41 = vpop.eup %2055  ;;  %v1542_v60 = vadd.f32 1.0, %v2054_v43 }
 0x5e4   : > { %v1566_v5 = vsel %vm1565_vm12, %v2052_v25, %v1562_v58  ;;  %v1574_v1 = vmul.f32 %v2056_v41, %v1541_v2  ;;  %vm1579_vm14 = vweird.f32 %v2056_v41  ;;  %v1707_v4 = vpop.f32.mrf.mxu1 }
 0x5e5   : > { %2057 = vrcp.f32 %v1542_v60  ;;  %v1571_v46 = vsel %vm1568_vm13, %v1570_v29, %v1566_v5  ;;  %vm1580_vm0 = vmor %vm1578_vm15, %vm1579_vm14  ;;  %v1599_v42 = vand.u32 2147483648, %v1542_v60  ;;  %v1597_v59 = vand.u32 2147483647, %v1542_v60 }
 0x5e6   : > { %1845 = vmatmul.msk.f32.gmra.mxu0 %vm1604_vm8, %v1571_v46  ;;  %v1575_v53 = vsub.f32 1.0, %v1574_v1  ;;  %vm1593_vm3 = vweird.f32 %v1542_v60  ;;  %v1708_v8 = vadd.f32 %v1707_v4, %v1673_v16 }
 0x5e7   : > { %v1600_v48 = vor.u32 1.1754944e-38, %v1599_v42  ;;  %vm1598_vm5 = vcmp.eq.f32.partialorder %v1597_v59, 8.507059e+37 }
 0x5e8   : > { %v1576_v55 = vmul.f32 %v2056_v41, %v1575_v53 }
 0x5ea   : > { %v1577_v3 = vadd.f32 %v2056_v41, %v1576_v55 }
 0x5eb   : > { %v2058_v9 = vpop.eup %2057 }
 0x5ec   : > { %v1581_v18 = vsel %vm1580_vm0, %v2056_v41, %v1577_v3  ;;  %v1589_v49 = vmul.f32 %v2058_v9, %v1542_v60  ;;  %vm1594_vm2 = vweird.f32 %v2058_v9 }
 0x5ed   : > { %v1586_v39 = vsel %vm1583_vm1, %v1585_v28, %v1581_v18  ;;  %vm1595_vm4 = vmor %vm1593_vm3, %vm1594_vm2 }
 0x5ee   : > { %1846 = vmatmul.msk.f32.gmra.mxu0 %vm1604_vm8, %v1586_v39  ;;  %v1590_v54 = vsub.f32 1.0, %v1589_v49 }
 0x5f0   : > { %v1591_v13 = vmul.f32 %v2058_v9, %v1590_v54 }
 0x5f2   : > { %v1592_v57 = vadd.f32 %v2058_v9, %v1591_v13 }
 0x5f4   : > { %v1596_v0 = vsel %vm1595_vm4, %v2058_v9, %v1592_v57 }
 0x5f5   : > { %v1601_v20 = vsel %vm1598_vm5, %v1600_v48, %v1596_v0 }
 0x5f6   : > { %1847 = vmatmul.msk.f32.gmra.mxu0 %vm1604_vm8, %v1601_v20 }
 0x65b   : > { %v1638_v52 = vpop.f32.mrf.mxu0 }
 0x65c   : > { %v1650_v44 = vmul.f32 %v1638_v52, %v3136_v24 }
 0x65e   : > { %v1710_v35 = vadd.f32 %v1701_v11, %v1650_v44 }
 0x660   : > { %v1714_v19 = vmax.f32 %v1710_v35, 0.0 }
 0x662   : > { %1718 = vst [vmem:[%s450_s0] sm:$0xff] %v1714_v19 }
 0x663   : > { %v1641_v45 = vpop.f32.mrf.mxu0 }
 0x664   : > { %v1651_v34 = vmul.f32 %v1641_v45, %v3139_v61 }
 0x666   : > { %v1711_v21 = vadd.f32 %v1703_v27, %v1651_v34 }
 0x668   : > { %v1715_v38 = vmax.f32 %v1711_v21, 0.0 }
 0x66a   : > { %1719 = vst [vmem:[%s450_s0 + $0x8] sm:$0xff] %v1715_v38 }
 0x66b   : > { %v1644_v62 = vpop.f32.mrf.mxu0 }
 0x66c   : > { %v1652_v24 = vmul.f32 %v1644_v62, %v3142_v15 }
 0x66e   : > { %v1712_v63 = vadd.f32 %v1706_v31, %v1652_v24 }
 0x670   : > { %v1716_v14 = vmax.f32 %v1712_v63, 0.0 }
 0x672   : > { %1720 = vst [vmem:[%s450_s0 + $0x10] sm:$0xff] %v1716_v14 }
 0x673   : > { %v1647_v61 = vpop.f32.mrf.mxu0 }
 0x674   : > { %v1653_v6 = vmul.f32 %v1647_v61, %v3145_v51 }
 0x676   : > { %v1713_v15 = vadd.f32 %v1708_v8, %v1653_v6 }
 0x678   : > { %v1717_v25 = vmax.f32 %v1713_v15, 0.0 }
 0x67a   : > { %1721 = vst [vmem:[%s450_s0 + $0x18] sm:$0xff] %v1717_v25 }
 0x67b   : > { %2094 = shalt.err (!%p2091_p5)
}
 0x67c   : > { %s2160_s15 = smov 128   ;;  %s2161_s0 = smov 256  }
 0x67d   : > { %s2162_s26 = smov 8  }
 0x67e   : > { %1870 = dma.vmem_to_hbm [thread:$0]  (%p2266_p6), %s1735_s18, 512, %s1737_s19, %s1723_s25, %s2160_s15, %s2161_s0, %s2162_s26  }
 0x67f PF: > { %s1751_s2 = sand.u32 1, %s2117_s21   ;;  %p1873_p7 = pnand %p1807_p9, %p2270_p8 }
 0x680   : > { %s1752_s1 = scalar_lea.sflag [#allocation4], %s1751_s2 }
 0x681   : > { %p1874_p10 = pneg %p1873_p7 }
 0x683   : > { %2112 = dma.done.wait (%p1874_p10), %s1752_s1, 512  }
 0x684   : > { %2114 = vsyncadd (%p1874_p10), %s1752_s1, 4294966784  ;;  %p22_p11 = scmp.ge.s32.totalorder %s2251_s27, 4   ;;  %s3346_s21 = smov %s2121_s22 }
 0x685   : > { %s3347_s22 = smov %s2125_s23  ;;  %s3348_s23 = smov %s2264_s30 }
 0x686   : > { %s3349_s24 = smov %s2251_s27  ;;  %24 = sbr.rel (!%p22_p11) target bundleno = 7 (0x7), region = 146 }
 0x68b   :  { %1758 = vsyncpa [#allocation4], 1 }
 0x68c   :  { %1760 = vsyncpa [#allocation4 + $0x1], 1 }

</bundles_post_ra>
